<compile_context>
chip_gen: v6e
topology: v6e:2x2x1
jax: 0.10.0
libtpu: 0.0.40
codegen_flags: <defaults>
</compile_context>

<pallas_src>
import functools

import numpy as np
import jax
import jax.numpy as jnp
from jax import lax
from jax.experimental import pallas as pl
from jax.experimental.pallas import tpu as pltpu


def _wordrep_kernel(xemb_ref, lens_ref, wrow_ref,      # per-tile inputs
                    wih_ref, whh_ref, b_ref,           # fused BiLSTM weights (transposed)
                    out_ref,                           # (TILE_N, D_pad)
                    *, T, H, Hp, D_w, TILE_N, D_pad):
    D_c = xemb_ref.shape[0]
    G1 = 4 * Hp                                        # per-direction fused gate rows [i|f|o|g]

    # ---- Hoisted input projection: both directions, all T timesteps, one MXU matmul ----
    # xemb block is (D_c, T, TILE_N); merge (T, TILE_N) into the lane dim once per tile.
    x2 = xemb_ref[...].reshape(D_c, T * TILE_N)                        # (D_c, T*TILE_N)
    xg = jnp.dot(wih_ref[...], x2,
                 preferred_element_type=jnp.float32) + b_ref[...]      # (2*G1, T*TILE_N)
    xg_f = xg[0:G1]                                                    # fwd gates, time t
    xg_b = xg[G1:2 * G1]                                               # bwd gates, time t

    lens = lens_ref[...]                               # (1, TILE_N) int32
    whh = whh_ref[...]                                 # (2*G1, 2*Hp) block-structured

    h_f = jnp.zeros((Hp, TILE_N), jnp.float32)
    c_f = jnp.zeros((Hp, TILE_N), jnp.float32)
    h_b = jnp.zeros((Hp, TILE_N), jnp.float32)
    c_b = jnp.zeros((Hp, TILE_N), jnp.float32)

    def sigmoid(v):
        # exp on the EUP + exact reciprocal (no approx error through the forget gate).
        return pl.reciprocal(1.0 + jnp.exp(-v), approx=False)

    def cell(gates, c):
        # gates: (4*Hp, TILE_N), row order [i | f | o | g]; every slice is 8-sublane aligned.
        sg = sigmoid(gates[0:3 * Hp])                  # one contiguous EUP pass over i|f|o
        g = jnp.tanh(gates[3 * Hp:4 * Hp])
        i, f, o = sg[0:Hp], sg[Hp:2 * Hp], sg[2 * Hp:3 * Hp]
        c_new = f * c + i * g
        h_new = o * jnp.tanh(c_new)
        return h_new, c_new

    def step(t, tb, xg_t, xg_tb, carry):
        h_f, c_f, h_b, c_b = carry
        h = jnp.concatenate([h_f, h_b], axis=0)        # (2*Hp, TILE_N)
        gh = jnp.dot(whh, h, preferred_element_type=jnp.float32)       # (2*G1, TILE_N)
        h_f_n, c_f_n = cell(gh[0:G1] + xg_t, c_f)
        h_b_n, c_b_n = cell(gh[G1:2 * G1] + xg_tb, c_b)
        # Packed-sequence semantics: freeze state on padded char positions (one vsel).
        keep_f = lens > t                              # (1, TILE_N) bool, broadcasts
        keep_b = lens > tb
        h_f = jnp.where(keep_f, h_f_n, h_f)
        c_f = jnp.where(keep_f, c_f_n, c_f)
        h_b = jnp.where(keep_b, h_b_n, h_b)
        c_b = jnp.where(keep_b, c_b_n, c_b)
        return h_f, c_f, h_b, c_b

    carry = (h_f, c_f, h_b, c_b)
    if T <= 16:
        # Small, static T: full unroll; fwd (t) and bwd (T-1-t) chains interleave and fill
        # each other's MXU/EUP pipeline bubbles.
        for t in range(T):
            tb = T - 1 - t
            carry = step(t, tb,
                         xg_f[:, t * TILE_N:(t + 1) * TILE_N],
                         xg_b[:, tb * TILE_N:(tb + 1) * TILE_N],
                         carry)
    else:
        # Large T: visible loop with modest unroll keeps vreg live-ranges bounded.
        def body(t, carry):
            tb = T - 1 - t
            xg_t = lax.dynamic_slice_in_dim(
                xg_f, pl.multiple_of(t * TILE_N, TILE_N), TILE_N, axis=1)
            xg_tb = lax.dynamic_slice_in_dim(
                xg_b, pl.multiple_of(tb * TILE_N, TILE_N), TILE_N, axis=1)
            return step(t, tb, xg_t, xg_tb, carry)
        carry = lax.fori_loop(0, T, body, carry, unroll=2)
    h_f, _, h_b, _ = carry

    # One small transpose per direction back to (TILE_N, H) for the lane-dense output slab.
    hf_T = jnp.transpose(h_f)[:, 0:H]                  # (TILE_N, H)
    hb_T = jnp.transpose(h_b)[:, 0:H]
    pieces = [wrow_ref[...], hf_T, hb_T]
    pad = D_pad - (D_w + 2 * H)
    if pad > 0:
        pieces.append(jnp.zeros((TILE_N, pad), jnp.float32))
    # Single lane-dense (TILE_N, D_pad) store; wrapper slices off the zero padding.
    out_ref[...] = jnp.concatenate(pieces, axis=-1)


def _pack_bilstm(params, H, Hp):
    """Pack per-direction (in, 4H) [i,f,g,o] weights into fused, transposed, padded
    matrices with per-gate 8-sublane-aligned segments in order [i, f, o, g]."""
    order = (0, 1, 3, 2)                               # PyTorch [i,f,g,o] -> [i,f,o,g]

    def pack_dir(wih, whh, b):
        wih = wih.astype(jnp.float32)
        whh = whh.astype(jnp.float32)
        b = b.astype(jnp.float32)

        def seg(a, g):                                 # (in_dim, H) slice -> (Hp, in_dim)
            s = a[:, g * H:(g + 1) * H].T
            return jnp.pad(s, ((0, Hp - H), (0, 0)))

        wih_T = jnp.concatenate([seg(wih, g) for g in order], axis=0)   # (4Hp, D_c)
        whh_T = jnp.concatenate([seg(whh, g) for g in order], axis=0)   # (4Hp, H)
        b_T = jnp.concatenate([seg(b, g) for g in order], axis=0)       # (4Hp, 1)
        return wih_T, whh_T, b_T

    wih_f, whh_f, b_f = pack_dir(params["wih_f"], params["whh_f"], params["b_f"])
    wih_b, whh_b, b_b = pack_dir(params["wih_b"], params["whh_b"], params["b_b"])

    wih_fused = jnp.concatenate([wih_f, wih_b], axis=0)                 # (8Hp, D_c)
    b_fused = jnp.concatenate([b_f, b_b], axis=0)                       # (8Hp, 1)

    zpad = jnp.zeros((4 * Hp, Hp), jnp.float32)
    whh_f_blk = jnp.concatenate([jnp.pad(whh_f, ((0, 0), (0, Hp - H))), zpad], axis=1)
    whh_b_blk = jnp.concatenate([zpad, jnp.pad(whh_b, ((0, 0), (0, Hp - H)))], axis=1)
    whh_fused = jnp.concatenate([whh_f_blk, whh_b_blk], axis=0)         # (8Hp, 2Hp)
    return wih_fused, whh_fused, b_fused


def wordrep_pallas(params, word_inputs, word_seq_lengths, char_inputs,
                   char_seq_lengths, char_seq_recover, *, tile_n=128):
    del word_seq_lengths  # not used by the forward computation itself
    B, S = word_inputs.shape
    N, T = char_inputs.shape
    D_w = params["word_emb"].shape[1]
    D_c = params["char_emb"].shape[1]
    H = params["whh_f"].shape[0]
    Hp = ((H + 7) // 8) * 8                  # per-direction hidden, sublane-aligned
    D_out = D_w + 2 * H
    D_pad = pl.cdiv(D_out, 128) * 128        # lane-padded output width

    recover = char_seq_recover.reshape(-1).astype(jnp.int32)
    lens = char_seq_lengths.reshape(-1).astype(jnp.int32)[recover]       # original word order
    cids = char_inputs.astype(jnp.int32)[recover]                        # (N, T) original order

    # Embedding gathers stay in XLA; char gather goes straight into the kernel's
    # (D_c, T, N) batch-on-lanes layout (no separate transpose / extra HBM pass).
    cemb_T = params["char_emb"].astype(jnp.float32).T                    # (D_c, V_c)
    xemb = jnp.take(cemb_T, cids.T, axis=1)                              # (D_c, T, N)
    wrows = jnp.take(params["word_emb"].astype(jnp.float32),
                     word_inputs.reshape(-1).astype(jnp.int32), axis=0)  # (N, D_w)

    n_tiles = pl.cdiv(N, tile_n)
    N_pad = n_tiles * tile_n
    if N_pad != N:
        xemb = jnp.pad(xemb, ((0, 0), (0, 0), (0, N_pad - N)))
        wrows = jnp.pad(wrows, ((0, N_pad - N), (0, 0)))
        lens = jnp.pad(lens, (0, N_pad - N))      # padded rows: len 0 -> state stays 0
    lens2d = lens.reshape(1, N_pad)

    wih_fused, whh_fused, b_fused = _pack_bilstm(params, H, Hp)

    kernel = functools.partial(_wordrep_kernel, T=T, H=H, Hp=Hp, D_w=D_w,
                               TILE_N=tile_n, D_pad=D_pad)

    grid_spec = pltpu.PrefetchScalarGridSpec(
        num_scalar_prefetch=0,
        grid=(n_tiles,),
        in_specs=[
            pl.BlockSpec((D_c, T, tile_n), lambda i: (0, 0, i)),   # char embs (batch-on-lanes)
            pl.BlockSpec((1, tile_n), lambda i: (0, i)),           # char lengths
            pl.BlockSpec((tile_n, D_w), lambda i: (i, 0)),         # word-embedding rows
            pl.BlockSpec((8 * Hp, D_c), lambda i: (0, 0)),         # fused Wih^T (grid-invariant)
            pl.BlockSpec((8 * Hp, 2 * Hp), lambda i: (0, 0)),      # fused Whh^T (grid-invariant)
            pl.BlockSpec((8 * Hp, 1), lambda i: (0, 0)),           # fused bias  (grid-invariant)
        ],
        out_specs=pl.BlockSpec((tile_n, D_pad), lambda i: (i, 0)),
    )

    out = pl.pallas_call(
        kernel,
        out_shape=jax.ShapeDtypeStruct((N_pad, D_pad), jnp.float32),
        grid_spec=grid_spec,
        compiler_params=pltpu.CompilerParams(
            dimension_semantics=("parallel",),   # disjoint output tiles -> megacore/2-TC safe
        ),
    )(xemb, lens2d, wrows, wih_fused, whh_fused, b_fused)

    # TODO(synk): nn.Dropout (self.drop / char_drop) is identity in eval mode; the
    # training-mode Bernoulli mask (pltpu.prng_*) is not implemented.
    return out[:N, :D_out].reshape(B, S, D_out)


# ---------------------------------------------------------------------------
# Pure-JAX reference matching WordRep.forward (dropout in eval mode).
# ---------------------------------------------------------------------------
def _lstm_cell_ref(x, h, c, wih, whh, b, H):
    gates = (jnp.dot(x, wih, preferred_element_type=jnp.float32)
             + jnp.dot(h, whh, preferred_element_type=jnp.float32) + b)
    i = jax.nn.sigmoid(gates[:, 0:H])
    f = jax.nn.sigmoid(gates[:, H:2 * H])
    g = jnp.tanh(gates[:, 2 * H:3 * H])
    o = jax.nn.sigmoid(gates[:, 3 * H:4 * H])
    c_new = f * c + i * g
    h_new = o * jnp.tanh(c_new)
    return h_new, c_new


def wordrep_ref(params, word_inputs, char_inputs, char_seq_lengths, char_seq_recover):
    B, S = word_inputs.shape
    N, T = char_inputs.shape
    H = params["whh_f"].shape[0]
    wemb = params["word_emb"][word_inputs]                   # (B, S, D_w)
    cemb = params["char_emb"][char_inputs]                   # (N, T, D_c)

    def run_dir(wih, whh, b, reverse):
        h = jnp.zeros((N, H), jnp.float32)
        c = jnp.zeros((N, H), jnp.float32)
        order = range(T - 1, -1, -1) if reverse else range(T)
        for t in order:
            x = cemb[:, t, :]
            h_new, c_new = _lstm_cell_ref(x, h, c, wih, whh, b, H)
            m = (t < char_seq_lengths).astype(jnp.float32)[:, None]
            h = m * h_new + (1.0 - m) * h
            c = m * c_new + (1.0 - m) * c
        return h

    h_f = run_dir(params["wih_f"], params["whh_f"], params["b_f"], False)
    h_b = run_dir(params["wih_b"], params["whh_b"], params["b_b"], True)
    char_feat = jnp.concatenate([h_f, h_b], axis=1)[char_seq_recover]
    char_feat = char_feat.reshape(B, S, -1)
    return jnp.concatenate([wemb, char_feat], axis=2)


if __name__ == "__main__":
    # Small shapes consistent with WordRep's forward contract.
    B, S = 2, 8                      # batch, sent_len
    N, T = B * S, 8                  # num words, max chars per word
    V_w, D_w = 50, 32                # word vocab / word_emb_dim
    V_c, D_c = 20, 8                 # char vocab / char_emb_dim
    char_hidden_dim = 16
    H = char_hidden_dim // 2         # per-direction LSTM hidden

    key = jax.random.PRNGKey(0)
    keys = jax.random.split(key, 12)

    scale_w = float(np.sqrt(3.0 / D_w))
    scale_c = float(np.sqrt(3.0 / D_c))
    k = float(1.0 / np.sqrt(H))
    params = {
        "word_emb": jax.random.uniform(keys[0], (V_w, D_w), jnp.float32, -scale_w, scale_w),
        "char_emb": jax.random.uniform(keys[1], (V_c, D_c), jnp.float32, -scale_c, scale_c),
        "wih_f": jax.random.uniform(keys[2], (D_c, 4 * H), jnp.float32, -k, k),
        "whh_f": jax.random.uniform(keys[3], (H, 4 * H), jnp.float32, -k, k),
        "b_f":   jax.random.uniform(keys[4], (1, 4 * H), jnp.float32, -k, k),
        "wih_b": jax.random.uniform(keys[5], (D_c, 4 * H), jnp.float32, -k, k),
        "whh_b": jax.random.uniform(keys[6], (H, 4 * H), jnp.float32, -k, k),
        "b_b":   jax.random.uniform(keys[7], (1, 4 * H), jnp.float32, -k, k),
    }

    word_inputs = jax.random.randint(keys[8], (B, S), 0, V_w, jnp.int32)
    word_seq_lengths = jnp.full((B,), S, jnp.int32)

    # Char inputs in original order, then sorted by descending length (pack_padded style).
    lens_orig = np.asarray(jax.random.randint(keys[9], (N,), 1, T + 1, jnp.int32))
    chars_orig = np.asarray(jax.random.randint(keys[10], (N, T), 1, V_c, jnp.int32))
    valid_mask = np.arange(T)[None, :] < lens_orig[:, None]
    chars_orig = np.where(valid_mask, chars_orig, 0)         # pad char id = 0
    perm = np.argsort(-lens_orig, kind="stable")             # original -> sorted permutation
    char_inputs = jnp.asarray(chars_orig[perm], jnp.int32)
    char_seq_lengths = jnp.asarray(lens_orig[perm], jnp.int32)
    char_seq_recover = jnp.asarray(np.argsort(perm, kind="stable"), jnp.int32)

    out = wordrep_pallas(params, word_inputs, word_seq_lengths,
                         char_inputs, char_seq_lengths, char_seq_recover)
    out = jax.block_until_ready(out)

    ref = wordrep_ref(params, word_inputs, char_inputs,
                      char_seq_lengths, char_seq_recover)
    assert out.shape == (B, S, D_w + char_hidden_dim)
    np.testing.assert_allclose(np.asarray(out), np.asarray(ref), rtol=1e-3, atol=1e-3)
    print("KERNEL_OK")
</pallas_src>

<mosaic_0001>
module attributes {stable_mosaic.version = 11 : i64} {
  func.func @_wordrep_kernel(%arg0: i32, %arg1: memref<8x8x128xf32, #tpu.memory_space<vmem>>, %arg2: memref<1x128xi32, #tpu.memory_space<vmem>>, %arg3: memref<128x32xf32, #tpu.memory_space<vmem>>, %arg4: memref<64x8xf32, #tpu.memory_space<vmem>>, %arg5: memref<64x16xf32, #tpu.memory_space<vmem>>, %arg6: memref<64x1xf32, #tpu.memory_space<vmem>>, %arg7: memref<128x128xf32, #tpu.memory_space<vmem>>) attributes {dimension_semantics = [#tpu.dimension_semantics<parallel>], iteration_bounds = array<i64: 1>, scalar_prefetch = 0 : i64, scratch_operands = 0 : i64, tpu.core_type = #tpu.core_type<tc>, window_params = [{transform_indices = @transform_0, window_bounds = array<i64: 8, 8, 128>}, {transform_indices = @transform_1, window_bounds = array<i64: 1, 128>}, {transform_indices = @transform_2, window_bounds = array<i64: 128, 32>}, {pipeline_mode = #tpu.pipeline_mode<synchronous>, transform_indices = @transform_3, window_bounds = array<i64: 64, 8>}, {pipeline_mode = #tpu.pipeline_mode<synchronous>, transform_indices = @transform_4, window_bounds = array<i64: 64, 16>}, {pipeline_mode = #tpu.pipeline_mode<synchronous>, transform_indices = @transform_5, window_bounds = array<i64: 64, 1>}, {transform_indices = @transform_6, window_bounds = array<i64: 128, 128>}]} {
    %c0 = arith.constant 0 : index
    %c0_0 = arith.constant 0 : index
    %c0_1 = arith.constant 0 : index
    %0 = vector.load %arg1[%c0, %c0_0, %c0_1] : memref<8x8x128xf32, #tpu.memory_space<vmem>>, vector<8x8x128xf32>
    %1 = vector.shape_cast %0 : vector<8x8x128xf32> to vector<8x1024xf32>
    %c0_2 = arith.constant 0 : index
    %c0_3 = arith.constant 0 : index
    %2 = vector.load %arg4[%c0_2, %c0_3] : memref<64x8xf32, #tpu.memory_space<vmem>>, vector<64x8xf32>
    %cst = arith.constant dense<0.000000e+00> : vector<64x1024xf32>
    %3 = tpu.matmul %2, %1, %cst {dimension_numbers = #tpu.dot_dimension_numbers<[1], [0], [0], [1], [0, 0, 1, 1], [], []>} : vector<64x8xf32>, vector<8x1024xf32>, vector<64x1024xf32> -> vector<64x1024xf32>
    %c0_4 = arith.constant 0 : index
    %c0_5 = arith.constant 0 : index
    %4 = vector.load %arg6[%c0_4, %c0_5] : memref<64x1xf32, #tpu.memory_space<vmem>>, vector<64x1xf32>
    %5 = vector.broadcast %4 : vector<64x1xf32> to vector<64x1024xf32>
    %6 = arith.addf %3, %5 : vector<64x1024xf32>
    %7 = vector.extract_strided_slice %6 {offsets = [0, 0], sizes = [32, 1024], strides = [1, 1]} : vector<64x1024xf32> to vector<32x1024xf32>
    %8 = vector.extract_strided_slice %6 {offsets = [32, 0], sizes = [32, 1024], strides = [1, 1]} : vector<64x1024xf32> to vector<32x1024xf32>
    %c0_6 = arith.constant 0 : index
    %c0_7 = arith.constant 0 : index
    %9 = vector.load %arg2[%c0_6, %c0_7] : memref<1x128xi32, #tpu.memory_space<vmem>>, vector<1x128xi32>
    %c0_8 = arith.constant 0 : index
    %c0_9 = arith.constant 0 : index
    %10 = vector.load %arg5[%c0_8, %c0_9] : memref<64x16xf32, #tpu.memory_space<vmem>>, vector<64x16xf32>
    %cst_10 = arith.constant 0.000000e+00 : f32
    %11 = vector.broadcast %cst_10 : f32 to vector<8x128xf32>
    %cst_11 = arith.constant 0.000000e+00 : f32
    %12 = vector.broadcast %cst_11 : f32 to vector<8x128xf32>
    %cst_12 = arith.constant 0.000000e+00 : f32
    %13 = vector.broadcast %cst_12 : f32 to vector<8x128xf32>
    %cst_13 = arith.constant 0.000000e+00 : f32
    %14 = vector.broadcast %cst_13 : f32 to vector<8x128xf32>
    %15 = vector.extract_strided_slice %7 {offsets = [0, 0], sizes = [32, 128], strides = [1, 1]} : vector<32x1024xf32> to vector<32x128xf32>
    %16 = vector.extract_strided_slice %8 {offsets = [0, 896], sizes = [32, 128], strides = [1, 1]} : vector<32x1024xf32> to vector<32x128xf32>
    %17 = tpu.concatenate %11, %13 in 0 : vector<8x128xf32>, vector<8x128xf32> -> vector<16x128xf32>
    %cst_14 = arith.constant dense<0.000000e+00> : vector<64x128xf32>
    %18 = tpu.matmul %10, %17, %cst_14 {dimension_numbers = #tpu.dot_dimension_numbers<[1], [0], [0], [1], [0, 0, 1, 1], [], []>} : vector<64x16xf32>, vector<16x128xf32>, vector<64x128xf32> -> vector<64x128xf32>
    %19 = vector.extract_strided_slice %18 {offsets = [0, 0], sizes = [32, 128], strides = [1, 1]} : vector<64x128xf32> to vector<32x128xf32>
    %20 = arith.addf %19, %15 : vector<32x128xf32>
    %21 = vector.extract_strided_slice %20 {offsets = [0, 0], sizes = [24, 128], strides = [1, 1]} : vector<32x128xf32> to vector<24x128xf32>
    %cst_15 = arith.constant 0.000000e+00 : f32
    %22 = vector.broadcast %cst_15 : f32 to vector<24x128xf32>
    %23 = arith.subf %22, %21 : vector<24x128xf32>
    %24 = math.exp %23 : vector<24x128xf32>
    %cst_16 = arith.constant 1.000000e+00 : f32
    %25 = vector.broadcast %cst_16 : f32 to vector<24x128xf32>
    %26 = arith.addf %25, %24 : vector<24x128xf32>
    %27 = tpu.reciprocal %26 : vector<24x128xf32> -> vector<24x128xf32>
    %28 = vector.extract_strided_slice %20 {offsets = [24, 0], sizes = [8, 128], strides = [1, 1]} : vector<32x128xf32> to vector<8x128xf32>
    %29 = math.tanh %28 : vector<8x128xf32>
    %30 = vector.extract_strided_slice %27 {offsets = [0, 0], sizes = [8, 128], strides = [1, 1]} : vector<24x128xf32> to vector<8x128xf32>
    %31 = vector.extract_strided_slice %27 {offsets = [8, 0], sizes = [8, 128], strides = [1, 1]} : vector<24x128xf32> to vector<8x128xf32>
    %32 = vector.extract_strided_slice %27 {offsets = [16, 0], sizes = [8, 128], strides = [1, 1]} : vector<24x128xf32> to vector<8x128xf32>
    %33 = arith.mulf %31, %12 : vector<8x128xf32>
    %34 = arith.mulf %30, %29 : vector<8x128xf32>
    %35 = arith.addf %33, %34 : vector<8x128xf32>
    %36 = math.tanh %35 : vector<8x128xf32>
    %37 = arith.mulf %32, %36 : vector<8x128xf32>
    %38 = vector.extract_strided_slice %18 {offsets = [32, 0], sizes = [32, 128], strides = [1, 1]} : vector<64x128xf32> to vector<32x128xf32>
    %39 = arith.addf %38, %16 : vector<32x128xf32>
    %40 = vector.extract_strided_slice %39 {offsets = [0, 0], sizes = [24, 128], strides = [1, 1]} : vector<32x128xf32> to vector<24x128xf32>
    %cst_17 = arith.constant 0.000000e+00 : f32
    %41 = vector.broadcast %cst_17 : f32 to vector<24x128xf32>
    %42 = arith.subf %41, %40 : vector<24x128xf32>
    %43 = math.exp %42 : vector<24x128xf32>
    %cst_18 = arith.constant 1.000000e+00 : f32
    %44 = vector.broadcast %cst_18 : f32 to vector<24x128xf32>
    %45 = arith.addf %44, %43 : vector<24x128xf32>
    %46 = tpu.reciprocal %45 : vector<24x128xf32> -> vector<24x128xf32>
    %47 = vector.extract_strided_slice %39 {offsets = [24, 0], sizes = [8, 128], strides = [1, 1]} : vector<32x128xf32> to vector<8x128xf32>
    %48 = math.tanh %47 : vector<8x128xf32>
    %49 = vector.extract_strided_slice %46 {offsets = [0, 0], sizes = [8, 128], strides = [1, 1]} : vector<24x128xf32> to vector<8x128xf32>
    %50 = vector.extract_strided_slice %46 {offsets = [8, 0], sizes = [8, 128], strides = [1, 1]} : vector<24x128xf32> to vector<8x128xf32>
    %51 = vector.extract_strided_slice %46 {offsets = [16, 0], sizes = [8, 128], strides = [1, 1]} : vector<24x128xf32> to vector<8x128xf32>
    %52 = arith.mulf %50, %14 : vector<8x128xf32>
    %53 = arith.mulf %49, %48 : vector<8x128xf32>
    %54 = arith.addf %52, %53 : vector<8x128xf32>
    %55 = math.tanh %54 : vector<8x128xf32>
    %56 = arith.mulf %51, %55 : vector<8x128xf32>
    %c0_i32 = arith.constant 0 : i32
    %57 = vector.broadcast %c0_i32 : i32 to vector<1x128xi32>
    %58 = arith.cmpi sgt, %9, %57 : vector<1x128xi32>
    %c7_i32 = arith.constant 7 : i32
    %59 = vector.broadcast %c7_i32 : i32 to vector<1x128xi32>
    %60 = arith.cmpi sgt, %9, %59 : vector<1x128xi32>
    %61 = vector.shape_cast %58 : vector<1x128xi1> to vector<1x128xi1>
    %62 = vector.broadcast %61 : vector<1x128xi1> to vector<8x128xi1>
    %63 = arith.select %62, %37, %11 : vector<8x128xi1>, vector<8x128xf32>
    %64 = vector.shape_cast %58 : vector<1x128xi1> to vector<1x128xi1>
    %65 = vector.broadcast %64 : vector<1x128xi1> to vector<8x128xi1>
    %66 = arith.select %65, %35, %12 : vector<8x128xi1>, vector<8x128xf32>
    %67 = vector.shape_cast %60 : vector<1x128xi1> to vector<1x128xi1>
    %68 = vector.broadcast %67 : vector<1x128xi1> to vector<8x128xi1>
    %69 = arith.select %68, %56, %13 : vector<8x128xi1>, vector<8x128xf32>
    %70 = vector.shape_cast %60 : vector<1x128xi1> to vector<1x128xi1>
    %71 = vector.broadcast %70 : vector<1x128xi1> to vector<8x128xi1>
    %72 = arith.select %71, %54, %14 : vector<8x128xi1>, vector<8x128xf32>
    %73 = vector.extract_strided_slice %7 {offsets = [0, 128], sizes = [32, 128], strides = [1, 1]} : vector<32x1024xf32> to vector<32x128xf32>
    %74 = vector.extract_strided_slice %8 {offsets = [0, 768], sizes = [32, 128], strides = [1, 1]} : vector<32x1024xf32> to vector<32x128xf32>
    %75 = tpu.concatenate %63, %69 in 0 : vector<8x128xf32>, vector<8x128xf32> -> vector<16x128xf32>
    %cst_19 = arith.constant dense<0.000000e+00> : vector<64x128xf32>
    %76 = tpu.matmul %10, %75, %cst_19 {dimension_numbers = #tpu.dot_dimension_numbers<[1], [0], [0], [1], [0, 0, 1, 1], [], []>} : vector<64x16xf32>, vector<16x128xf32>, vector<64x128xf32> -> vector<64x128xf32>
    %77 = vector.extract_strided_slice %76 {offsets = [0, 0], sizes = [32, 128], strides = [1, 1]} : vector<64x128xf32> to vector<32x128xf32>
    %78 = arith.addf %77, %73 : vector<32x128xf32>
    %79 = vector.extract_strided_slice %78 {offsets = [0, 0], sizes = [24, 128], strides = [1, 1]} : vector<32x128xf32> to vector<24x128xf32>
    %cst_20 = arith.constant 0.000000e+00 : f32
    %80 = vector.broadcast %cst_20 : f32 to vector<24x128xf32>
    %81 = arith.subf %80, %79 : vector<24x128xf32>
    %82 = math.exp %81 : vector<24x128xf32>
    %cst_21 = arith.constant 1.000000e+00 : f32
    %83 = vector.broadcast %cst_21 : f32 to vector<24x128xf32>
    %84 = arith.addf %83, %82 : vector<24x128xf32>
    %85 = tpu.reciprocal %84 : vector<24x128xf32> -> vector<24x128xf32>
    %86 = vector.extract_strided_slice %78 {offsets = [24, 0], sizes = [8, 128], strides = [1, 1]} : vector<32x128xf32> to vector<8x128xf32>
    %87 = math.tanh %86 : vector<8x128xf32>
    %88 = vector.extract_strided_slice %85 {offsets = [0, 0], sizes = [8, 128], strides = [1, 1]} : vector<24x128xf32> to vector<8x128xf32>
    %89 = vector.extract_strided_slice %85 {offsets = [8, 0], sizes = [8, 128], strides = [1, 1]} : vector<24x128xf32> to vector<8x128xf32>
    %90 = vector.extract_strided_slice %85 {offsets = [16, 0], sizes = [8, 128], strides = [1, 1]} : vector<24x128xf32> to vector<8x128xf32>
    %91 = arith.mulf %89, %66 : vector<8x128xf32>
    %92 = arith.mulf %88, %87 : vector<8x128xf32>
    %93 = arith.addf %91, %92 : vector<8x128xf32>
    %94 = math.tanh %93 : vector<8x128xf32>
    %95 = arith.mulf %90, %94 : vector<8x128xf32>
    %96 = vector.extract_strided_slice %76 {offsets = [32, 0], sizes = [32, 128], strides = [1, 1]} : vector<64x128xf32> to vector<32x128xf32>
    %97 = arith.addf %96, %74 : vector<32x128xf32>
    %98 = vector.extract_strided_slice %97 {offsets = [0, 0], sizes = [24, 128], strides = [1, 1]} : vector<32x128xf32> to vector<24x128xf32>
    %cst_22 = arith.constant 0.000000e+00 : f32
    %99 = vector.broadcast %cst_22 : f32 to vector<24x128xf32>
    %100 = arith.subf %99, %98 : vector<24x128xf32>
    %101 = math.exp %100 : vector<24x128xf32>
    %cst_23 = arith.constant 1.000000e+00 : f32
    %102 = vector.broadcast %cst_23 : f32 to vector<24x128xf32>
    %103 = arith.addf %102, %101 : vector<24x128xf32>
    %104 = tpu.reciprocal %103 : vector<24x128xf32> -> vector<24x128xf32>
    %105 = vector.extract_strided_slice %97 {offsets = [24, 0], sizes = [8, 128], strides = [1, 1]} : vector<32x128xf32> to vector<8x128xf32>
    %106 = math.tanh %105 : vector<8x128xf32>
    %107 = vector.extract_strided_slice %104 {offsets = [0, 0], sizes = [8, 128], strides = [1, 1]} : vector<24x128xf32> to vector<8x128xf32>
    %108 = vector.extract_strided_slice %104 {offsets = [8, 0], sizes = [8, 128], strides = [1, 1]} : vector<24x128xf32> to vector<8x128xf32>
    %109 = vector.extract_strided_slice %104 {offsets = [16, 0], sizes = [8, 128], strides = [1, 1]} : vector<24x128xf32> to vector<8x128xf32>
    %110 = arith.mulf %108, %72 : vector<8x128xf32>
    %111 = arith.mulf %107, %106 : vector<8x128xf32>
    %112 = arith.addf %110, %111 : vector<8x128xf32>
    %113 = math.tanh %112 : vector<8x128xf32>
    %114 = arith.mulf %109, %113 : vector<8x128xf32>
    %c1_i32 = arith.constant 1 : i32
    %115 = vector.broadcast %c1_i32 : i32 to vector<1x128xi32>
    %116 = arith.cmpi sgt, %9, %115 : vector<1x128xi32>
    %c6_i32 = arith.constant 6 : i32
    %117 = vector.broadcast %c6_i32 : i32 to vector<1x128xi32>
    %118 = arith.cmpi sgt, %9, %117 : vector<1x128xi32>
    %119 = vector.shape_cast %116 : vector<1x128xi1> to vector<1x128xi1>
    %120 = vector.broadcast %119 : vector<1x128xi1> to vector<8x128xi1>
    %121 = arith.select %120, %95, %63 : vector<8x128xi1>, vector<8x128xf32>
    %122 = vector.shape_cast %116 : vector<1x128xi1> to vector<1x128xi1>
    %123 = vector.broadcast %122 : vector<1x128xi1> to vector<8x128xi1>
    %124 = arith.select %123, %93, %66 : vector<8x128xi1>, vector<8x128xf32>
    %125 = vector.shape_cast %118 : vector<1x128xi1> to vector<1x128xi1>
    %126 = vector.broadcast %125 : vector<1x128xi1> to vector<8x128xi1>
    %127 = arith.select %126, %114, %69 : vector<8x128xi1>, vector<8x128xf32>
    %128 = vector.shape_cast %118 : vector<1x128xi1> to vector<1x128xi1>
    %129 = vector.broadcast %128 : vector<1x128xi1> to vector<8x128xi1>
    %130 = arith.select %129, %112, %72 : vector<8x128xi1>, vector<8x128xf32>
    %131 = vector.extract_strided_slice %7 {offsets = [0, 256], sizes = [32, 128], strides = [1, 1]} : vector<32x1024xf32> to vector<32x128xf32>
    %132 = vector.extract_strided_slice %8 {offsets = [0, 640], sizes = [32, 128], strides = [1, 1]} : vector<32x1024xf32> to vector<32x128xf32>
    %133 = tpu.concatenate %121, %127 in 0 : vector<8x128xf32>, vector<8x128xf32> -> vector<16x128xf32>
    %cst_24 = arith.constant dense<0.000000e+00> : vector<64x128xf32>
    %134 = tpu.matmul %10, %133, %cst_24 {dimension_numbers = #tpu.dot_dimension_numbers<[1], [0], [0], [1], [0, 0, 1, 1], [], []>} : vector<64x16xf32>, vector<16x128xf32>, vector<64x128xf32> -> vector<64x128xf32>
    %135 = vector.extract_strided_slice %134 {offsets = [0, 0], sizes = [32, 128], strides = [1, 1]} : vector<64x128xf32> to vector<32x128xf32>
    %136 = arith.addf %135, %131 : vector<32x128xf32>
    %137 = vector.extract_strided_slice %136 {offsets = [0, 0], sizes = [24, 128], strides = [1, 1]} : vector<32x128xf32> to vector<24x128xf32>
    %cst_25 = arith.constant 0.000000e+00 : f32
    %138 = vector.broadcast %cst_25 : f32 to vector<24x128xf32>
    %139 = arith.subf %138, %137 : vector<24x128xf32>
    %140 = math.exp %139 : vector<24x128xf32>
    %cst_26 = arith.constant 1.000000e+00 : f32
    %141 = vector.broadcast %cst_26 : f32 to vector<24x128xf32>
    %142 = arith.addf %141, %140 : vector<24x128xf32>
    %143 = tpu.reciprocal %142 : vector<24x128xf32> -> vector<24x128xf32>
    %144 = vector.extract_strided_slice %136 {offsets = [24, 0], sizes = [8, 128], strides = [1, 1]} : vector<32x128xf32> to vector<8x128xf32>
    %145 = math.tanh %144 : vector<8x128xf32>
    %146 = vector.extract_strided_slice %143 {offsets = [0, 0], sizes = [8, 128], strides = [1, 1]} : vector<24x128xf32> to vector<8x128xf32>
    %147 = vector.extract_strided_slice %143 {offsets = [8, 0], sizes = [8, 128], strides = [1, 1]} : vector<24x128xf32> to vector<8x128xf32>
    %148 = vector.extract_strided_slice %143 {offsets = [16, 0], sizes = [8, 128], strides = [1, 1]} : vector<24x128xf32> to vector<8x128xf32>
    %149 = arith.mulf %147, %124 : vector<8x128xf32>
    %150 = arith.mulf %146, %145 : vector<8x128xf32>
    %151 = arith.addf %149, %150 : vector<8x128xf32>
    %152 = math.tanh %151 : vector<8x128xf32>
    %153 = arith.mulf %148, %152 : vector<8x128xf32>
    %154 = vector.extract_strided_slice %134 {offsets = [32, 0], sizes = [32, 128], strides = [1, 1]} : vector<64x128xf32> to vector<32x128xf32>
    %155 = arith.addf %154, %132 : vector<32x128xf32>
    %156 = vector.extract_strided_slice %155 {offsets = [0, 0], sizes = [24, 128], strides = [1, 1]} : vector<32x128xf32> to vector<24x128xf32>
    %cst_27 = arith.constant 0.000000e+00 : f32
    %157 = vector.broadcast %cst_27 : f32 to vector<24x128xf32>
    %158 = arith.subf %157, %156 : vector<24x128xf32>
    %159 = math.exp %158 : vector<24x128xf32>
    %cst_28 = arith.constant 1.000000e+00 : f32
    %160 = vector.broadcast %cst_28 : f32 to vector<24x128xf32>
    %161 = arith.addf %160, %159 : vector<24x128xf32>
    %162 = tpu.reciprocal %161 : vector<24x128xf32> -> vector<24x128xf32>
    %163 = vector.extract_strided_slice %155 {offsets = [24, 0], sizes = [8, 128], strides = [1, 1]} : vector<32x128xf32> to vector<8x128xf32>
    %164 = math.tanh %163 : vector<8x128xf32>
    %165 = vector.extract_strided_slice %162 {offsets = [0, 0], sizes = [8, 128], strides = [1, 1]} : vector<24x128xf32> to vector<8x128xf32>
    %166 = vector.extract_strided_slice %162 {offsets = [8, 0], sizes = [8, 128], strides = [1, 1]} : vector<24x128xf32> to vector<8x128xf32>
    %167 = vector.extract_strided_slice %162 {offsets = [16, 0], sizes = [8, 128], strides = [1, 1]} : vector<24x128xf32> to vector<8x128xf32>
    %168 = arith.mulf %166, %130 : vector<8x128xf32>
    %169 = arith.mulf %165, %164 : vector<8x128xf32>
    %170 = arith.addf %168, %169 : vector<8x128xf32>
    %171 = math.tanh %170 : vector<8x128xf32>
    %172 = arith.mulf %167, %171 : vector<8x128xf32>
    %c2_i32 = arith.constant 2 : i32
    %173 = vector.broadcast %c2_i32 : i32 to vector<1x128xi32>
    %174 = arith.cmpi sgt, %9, %173 : vector<1x128xi32>
    %c5_i32 = arith.constant 5 : i32
    %175 = vector.broadcast %c5_i32 : i32 to vector<1x128xi32>
    %176 = arith.cmpi sgt, %9, %175 : vector<1x128xi32>
    %177 = vector.shape_cast %174 : vector<1x128xi1> to vector<1x128xi1>
    %178 = vector.broadcast %177 : vector<1x128xi1> to vector<8x128xi1>
    %179 = arith.select %178, %153, %121 : vector<8x128xi1>, vector<8x128xf32>
    %180 = vector.shape_cast %174 : vector<1x128xi1> to vector<1x128xi1>
    %181 = vector.broadcast %180 : vector<1x128xi1> to vector<8x128xi1>
    %182 = arith.select %181, %151, %124 : vector<8x128xi1>, vector<8x128xf32>
    %183 = vector.shape_cast %176 : vector<1x128xi1> to vector<1x128xi1>
    %184 = vector.broadcast %183 : vector<1x128xi1> to vector<8x128xi1>
    %185 = arith.select %184, %172, %127 : vector<8x128xi1>, vector<8x128xf32>
    %186 = vector.shape_cast %176 : vector<1x128xi1> to vector<1x128xi1>
    %187 = vector.broadcast %186 : vector<1x128xi1> to vector<8x128xi1>
    %188 = arith.select %187, %170, %130 : vector<8x128xi1>, vector<8x128xf32>
    %189 = vector.extract_strided_slice %7 {offsets = [0, 384], sizes = [32, 128], strides = [1, 1]} : vector<32x1024xf32> to vector<32x128xf32>
    %190 = vector.extract_strided_slice %8 {offsets = [0, 512], sizes = [32, 128], strides = [1, 1]} : vector<32x1024xf32> to vector<32x128xf32>
    %191 = tpu.concatenate %179, %185 in 0 : vector<8x128xf32>, vector<8x128xf32> -> vector<16x128xf32>
    %cst_29 = arith.constant dense<0.000000e+00> : vector<64x128xf32>
    %192 = tpu.matmul %10, %191, %cst_29 {dimension_numbers = #tpu.dot_dimension_numbers<[1], [0], [0], [1], [0, 0, 1, 1], [], []>} : vector<64x16xf32>, vector<16x128xf32>, vector<64x128xf32> -> vector<64x128xf32>
    %193 = vector.extract_strided_slice %192 {offsets = [0, 0], sizes = [32, 128], strides = [1, 1]} : vector<64x128xf32> to vector<32x128xf32>
    %194 = arith.addf %193, %189 : vector<32x128xf32>
    %195 = vector.extract_strided_slice %194 {offsets = [0, 0], sizes = [24, 128], strides = [1, 1]} : vector<32x128xf32> to vector<24x128xf32>
    %cst_30 = arith.constant 0.000000e+00 : f32
    %196 = vector.broadcast %cst_30 : f32 to vector<24x128xf32>
    %197 = arith.subf %196, %195 : vector<24x128xf32>
    %198 = math.exp %197 : vector<24x128xf32>
    %cst_31 = arith.constant 1.000000e+00 : f32
    %199 = vector.broadcast %cst_31 : f32 to vector<24x128xf32>
    %200 = arith.addf %199, %198 : vector<24x128xf32>
    %201 = tpu.reciprocal %200 : vector<24x128xf32> -> vector<24x128xf32>
    %202 = vector.extract_strided_slice %194 {offsets = [24, 0], sizes = [8, 128], strides = [1, 1]} : vector<32x128xf32> to vector<8x128xf32>
    %203 = math.tanh %202 : vector<8x128xf32>
    %204 = vector.extract_strided_slice %201 {offsets = [0, 0], sizes = [8, 128], strides = [1, 1]} : vector<24x128xf32> to vector<8x128xf32>
    %205 = vector.extract_strided_slice %201 {offsets = [8, 0], sizes = [8, 128], strides = [1, 1]} : vector<24x128xf32> to vector<8x128xf32>
    %206 = vector.extract_strided_slice %201 {offsets = [16, 0], sizes = [8, 128], strides = [1, 1]} : vector<24x128xf32> to vector<8x128xf32>
    %207 = arith.mulf %205, %182 : vector<8x128xf32>
    %208 = arith.mulf %204, %203 : vector<8x128xf32>
    %209 = arith.addf %207, %208 : vector<8x128xf32>
    %210 = math.tanh %209 : vector<8x128xf32>
    %211 = arith.mulf %206, %210 : vector<8x128xf32>
    %212 = vector.extract_strided_slice %192 {offsets = [32, 0], sizes = [32, 128], strides = [1, 1]} : vector<64x128xf32> to vector<32x128xf32>
    %213 = arith.addf %212, %190 : vector<32x128xf32>
    %214 = vector.extract_strided_slice %213 {offsets = [0, 0], sizes = [24, 128], strides = [1, 1]} : vector<32x128xf32> to vector<24x128xf32>
    %cst_32 = arith.constant 0.000000e+00 : f32
    %215 = vector.broadcast %cst_32 : f32 to vector<24x128xf32>
    %216 = arith.subf %215, %214 : vector<24x128xf32>
    %217 = math.exp %216 : vector<24x128xf32>
    %cst_33 = arith.constant 1.000000e+00 : f32
    %218 = vector.broadcast %cst_33 : f32 to vector<24x128xf32>
    %219 = arith.addf %218, %217 : vector<24x128xf32>
    %220 = tpu.reciprocal %219 : vector<24x128xf32> -> vector<24x128xf32>
    %221 = vector.extract_strided_slice %213 {offsets = [24, 0], sizes = [8, 128], strides = [1, 1]} : vector<32x128xf32> to vector<8x128xf32>
    %222 = math.tanh %221 : vector<8x128xf32>
    %223 = vector.extract_strided_slice %220 {offsets = [0, 0], sizes = [8, 128], strides = [1, 1]} : vector<24x128xf32> to vector<8x128xf32>
    %224 = vector.extract_strided_slice %220 {offsets = [8, 0], sizes = [8, 128], strides = [1, 1]} : vector<24x128xf32> to vector<8x128xf32>
    %225 = vector.extract_strided_slice %220 {offsets = [16, 0], sizes = [8, 128], strides = [1, 1]} : vector<24x128xf32> to vector<8x128xf32>
    %226 = arith.mulf %224, %188 : vector<8x128xf32>
    %227 = arith.mulf %223, %222 : vector<8x128xf32>
    %228 = arith.addf %226, %227 : vector<8x128xf32>
    %229 = math.tanh %228 : vector<8x128xf32>
    %230 = arith.mulf %225, %229 : vector<8x128xf32>
    %c3_i32 = arith.constant 3 : i32
    %231 = vector.broadcast %c3_i32 : i32 to vector<1x128xi32>
    %232 = arith.cmpi sgt, %9, %231 : vector<1x128xi32>
    %c4_i32 = arith.constant 4 : i32
    %233 = vector.broadcast %c4_i32 : i32 to vector<1x128xi32>
    %234 = arith.cmpi sgt, %9, %233 : vector<1x128xi32>
    %235 = vector.shape_cast %232 : vector<1x128xi1> to vector<1x128xi1>
    %236 = vector.broadcast %235 : vector<1x128xi1> to vector<8x128xi1>
    %237 = arith.select %236, %211, %179 : vector<8x128xi1>, vector<8x128xf32>
    %238 = vector.shape_cast %232 : vector<1x128xi1> to vector<1x128xi1>
    %239 = vector.broadcast %238 : vector<1x128xi1> to vector<8x128xi1>
    %240 = arith.select %239, %209, %182 : vector<8x128xi1>, vector<8x128xf32>
    %241 = vector.shape_cast %234 : vector<1x128xi1> to vector<1x128xi1>
    %242 = vector.broadcast %241 : vector<1x128xi1> to vector<8x128xi1>
    %243 = arith.select %242, %230, %185 : vector<8x128xi1>, vector<8x128xf32>
    %244 = vector.shape_cast %234 : vector<1x128xi1> to vector<1x128xi1>
    %245 = vector.broadcast %244 : vector<1x128xi1> to vector<8x128xi1>
    %246 = arith.select %245, %228, %188 : vector<8x128xi1>, vector<8x128xf32>
    %247 = vector.extract_strided_slice %7 {offsets = [0, 512], sizes = [32, 128], strides = [1, 1]} : vector<32x1024xf32> to vector<32x128xf32>
    %248 = vector.extract_strided_slice %8 {offsets = [0, 384], sizes = [32, 128], strides = [1, 1]} : vector<32x1024xf32> to vector<32x128xf32>
    %249 = tpu.concatenate %237, %243 in 0 : vector<8x128xf32>, vector<8x128xf32> -> vector<16x128xf32>
    %cst_34 = arith.constant dense<0.000000e+00> : vector<64x128xf32>
    %250 = tpu.matmul %10, %249, %cst_34 {dimension_numbers = #tpu.dot_dimension_numbers<[1], [0], [0], [1], [0, 0, 1, 1], [], []>} : vector<64x16xf32>, vector<16x128xf32>, vector<64x128xf32> -> vector<64x128xf32>
    %251 = vector.extract_strided_slice %250 {offsets = [0, 0], sizes = [32, 128], strides = [1, 1]} : vector<64x128xf32> to vector<32x128xf32>
    %252 = arith.addf %251, %247 : vector<32x128xf32>
    %253 = vector.extract_strided_slice %252 {offsets = [0, 0], sizes = [24, 128], strides = [1, 1]} : vector<32x128xf32> to vector<24x128xf32>
    %cst_35 = arith.constant 0.000000e+00 : f32
    %254 = vector.broadcast %cst_35 : f32 to vector<24x128xf32>
    %255 = arith.subf %254, %253 : vector<24x128xf32>
    %256 = math.exp %255 : vector<24x128xf32>
    %cst_36 = arith.constant 1.000000e+00 : f32
    %257 = vector.broadcast %cst_36 : f32 to vector<24x128xf32>
    %258 = arith.addf %257, %256 : vector<24x128xf32>
    %259 = tpu.reciprocal %258 : vector<24x128xf32> -> vector<24x128xf32>
    %260 = vector.extract_strided_slice %252 {offsets = [24, 0], sizes = [8, 128], strides = [1, 1]} : vector<32x128xf32> to vector<8x128xf32>
    %261 = math.tanh %260 : vector<8x128xf32>
    %262 = vector.extract_strided_slice %259 {offsets = [0, 0], sizes = [8, 128], strides = [1, 1]} : vector<24x128xf32> to vector<8x128xf32>
    %263 = vector.extract_strided_slice %259 {offsets = [8, 0], sizes = [8, 128], strides = [1, 1]} : vector<24x128xf32> to vector<8x128xf32>
    %264 = vector.extract_strided_slice %259 {offsets = [16, 0], sizes = [8, 128], strides = [1, 1]} : vector<24x128xf32> to vector<8x128xf32>
    %265 = arith.mulf %263, %240 : vector<8x128xf32>
    %266 = arith.mulf %262, %261 : vector<8x128xf32>
    %267 = arith.addf %265, %266 : vector<8x128xf32>
    %268 = math.tanh %267 : vector<8x128xf32>
    %269 = arith.mulf %264, %268 : vector<8x128xf32>
    %270 = vector.extract_strided_slice %250 {offsets = [32, 0], sizes = [32, 128], strides = [1, 1]} : vector<64x128xf32> to vector<32x128xf32>
    %271 = arith.addf %270, %248 : vector<32x128xf32>
    %272 = vector.extract_strided_slice %271 {offsets = [0, 0], sizes = [24, 128], strides = [1, 1]} : vector<32x128xf32> to vector<24x128xf32>
    %cst_37 = arith.constant 0.000000e+00 : f32
    %273 = vector.broadcast %cst_37 : f32 to vector<24x128xf32>
    %274 = arith.subf %273, %272 : vector<24x128xf32>
    %275 = math.exp %274 : vector<24x128xf32>
    %cst_38 = arith.constant 1.000000e+00 : f32
    %276 = vector.broadcast %cst_38 : f32 to vector<24x128xf32>
    %277 = arith.addf %276, %275 : vector<24x128xf32>
    %278 = tpu.reciprocal %277 : vector<24x128xf32> -> vector<24x128xf32>
    %279 = vector.extract_strided_slice %271 {offsets = [24, 0], sizes = [8, 128], strides = [1, 1]} : vector<32x128xf32> to vector<8x128xf32>
    %280 = math.tanh %279 : vector<8x128xf32>
    %281 = vector.extract_strided_slice %278 {offsets = [0, 0], sizes = [8, 128], strides = [1, 1]} : vector<24x128xf32> to vector<8x128xf32>
    %282 = vector.extract_strided_slice %278 {offsets = [8, 0], sizes = [8, 128], strides = [1, 1]} : vector<24x128xf32> to vector<8x128xf32>
    %283 = vector.extract_strided_slice %278 {offsets = [16, 0], sizes = [8, 128], strides = [1, 1]} : vector<24x128xf32> to vector<8x128xf32>
    %284 = arith.mulf %282, %246 : vector<8x128xf32>
    %285 = arith.mulf %281, %280 : vector<8x128xf32>
    %286 = arith.addf %284, %285 : vector<8x128xf32>
    %287 = math.tanh %286 : vector<8x128xf32>
    %288 = arith.mulf %283, %287 : vector<8x128xf32>
    %c4_i32_39 = arith.constant 4 : i32
    %289 = vector.broadcast %c4_i32_39 : i32 to vector<1x128xi32>
    %290 = arith.cmpi sgt, %9, %289 : vector<1x128xi32>
    %c3_i32_40 = arith.constant 3 : i32
    %291 = vector.broadcast %c3_i32_40 : i32 to vector<1x128xi32>
    %292 = arith.cmpi sgt, %9, %291 : vector<1x128xi32>
    %293 = vector.shape_cast %290 : vector<1x128xi1> to vector<1x128xi1>
    %294 = vector.broadcast %293 : vector<1x128xi1> to vector<8x128xi1>
    %295 = arith.select %294, %269, %237 : vector<8x128xi1>, vector<8x128xf32>
    %296 = vector.shape_cast %290 : vector<1x128xi1> to vector<1x128xi1>
    %297 = vector.broadcast %296 : vector<1x128xi1> to vector<8x128xi1>
    %298 = arith.select %297, %267, %240 : vector<8x128xi1>, vector<8x128xf32>
    %299 = vector.shape_cast %292 : vector<1x128xi1> to vector<1x128xi1>
    %300 = vector.broadcast %299 : vector<1x128xi1> to vector<8x128xi1>
    %301 = arith.select %300, %288, %243 : vector<8x128xi1>, vector<8x128xf32>
    %302 = vector.shape_cast %292 : vector<1x128xi1> to vector<1x128xi1>
    %303 = vector.broadcast %302 : vector<1x128xi1> to vector<8x128xi1>
    %304 = arith.select %303, %286, %246 : vector<8x128xi1>, vector<8x128xf32>
    %305 = vector.extract_strided_slice %7 {offsets = [0, 640], sizes = [32, 128], strides = [1, 1]} : vector<32x1024xf32> to vector<32x128xf32>
    %306 = vector.extract_strided_slice %8 {offsets = [0, 256], sizes = [32, 128], strides = [1, 1]} : vector<32x1024xf32> to vector<32x128xf32>
    %307 = tpu.concatenate %295, %301 in 0 : vector<8x128xf32>, vector<8x128xf32> -> vector<16x128xf32>
    %cst_41 = arith.constant dense<0.000000e+00> : vector<64x128xf32>
    %308 = tpu.matmul %10, %307, %cst_41 {dimension_numbers = #tpu.dot_dimension_numbers<[1], [0], [0], [1], [0, 0, 1, 1], [], []>} : vector<64x16xf32>, vector<16x128xf32>, vector<64x128xf32> -> vector<64x128xf32>
    %309 = vector.extract_strided_slice %308 {offsets = [0, 0], sizes = [32, 128], strides = [1, 1]} : vector<64x128xf32> to vector<32x128xf32>
    %310 = arith.addf %309, %305 : vector<32x128xf32>
    %311 = vector.extract_strided_slice %310 {offsets = [0, 0], sizes = [24, 128], strides = [1, 1]} : vector<32x128xf32> to vector<24x128xf32>
    %cst_42 = arith.constant 0.000000e+00 : f32
    %312 = vector.broadcast %cst_42 : f32 to vector<24x128xf32>
    %313 = arith.subf %312, %311 : vector<24x128xf32>
    %314 = math.exp %313 : vector<24x128xf32>
    %cst_43 = arith.constant 1.000000e+00 : f32
    %315 = vector.broadcast %cst_43 : f32 to vector<24x128xf32>
    %316 = arith.addf %315, %314 : vector<24x128xf32>
    %317 = tpu.reciprocal %316 : vector<24x128xf32> -> vector<24x128xf32>
    %318 = vector.extract_strided_slice %310 {offsets = [24, 0], sizes = [8, 128], strides = [1, 1]} : vector<32x128xf32> to vector<8x128xf32>
    %319 = math.tanh %318 : vector<8x128xf32>
    %320 = vector.extract_strided_slice %317 {offsets = [0, 0], sizes = [8, 128], strides = [1, 1]} : vector<24x128xf32> to vector<8x128xf32>
    %321 = vector.extract_strided_slice %317 {offsets = [8, 0], sizes = [8, 128], strides = [1, 1]} : vector<24x128xf32> to vector<8x128xf32>
    %322 = vector.extract_strided_slice %317 {offsets = [16, 0], sizes = [8, 128], strides = [1, 1]} : vector<24x128xf32> to vector<8x128xf32>
    %323 = arith.mulf %321, %298 : vector<8x128xf32>
    %324 = arith.mulf %320, %319 : vector<8x128xf32>
    %325 = arith.addf %323, %324 : vector<8x128xf32>
    %326 = math.tanh %325 : vector<8x128xf32>
    %327 = arith.mulf %322, %326 : vector<8x128xf32>
    %328 = vector.extract_strided_slice %308 {offsets = [32, 0], sizes = [32, 128], strides = [1, 1]} : vector<64x128xf32> to vector<32x128xf32>
    %329 = arith.addf %328, %306 : vector<32x128xf32>
    %330 = vector.extract_strided_slice %329 {offsets = [0, 0], sizes = [24, 128], strides = [1, 1]} : vector<32x128xf32> to vector<24x128xf32>
    %cst_44 = arith.constant 0.000000e+00 : f32
    %331 = vector.broadcast %cst_44 : f32 to vector<24x128xf32>
    %332 = arith.subf %331, %330 : vector<24x128xf32>
    %333 = math.exp %332 : vector<24x128xf32>
    %cst_45 = arith.constant 1.000000e+00 : f32
    %334 = vector.broadcast %cst_45 : f32 to vector<24x128xf32>
    %335 = arith.addf %334, %333 : vector<24x128xf32>
    %336 = tpu.reciprocal %335 : vector<24x128xf32> -> vector<24x128xf32>
    %337 = vector.extract_strided_slice %329 {offsets = [24, 0], sizes = [8, 128], strides = [1, 1]} : vector<32x128xf32> to vector<8x128xf32>
    %338 = math.tanh %337 : vector<8x128xf32>
    %339 = vector.extract_strided_slice %336 {offsets = [0, 0], sizes = [8, 128], strides = [1, 1]} : vector<24x128xf32> to vector<8x128xf32>
    %340 = vector.extract_strided_slice %336 {offsets = [8, 0], sizes = [8, 128], strides = [1, 1]} : vector<24x128xf32> to vector<8x128xf32>
    %341 = vector.extract_strided_slice %336 {offsets = [16, 0], sizes = [8, 128], strides = [1, 1]} : vector<24x128xf32> to vector<8x128xf32>
    %342 = arith.mulf %340, %304 : vector<8x128xf32>
    %343 = arith.mulf %339, %338 : vector<8x128xf32>
    %344 = arith.addf %342, %343 : vector<8x128xf32>
    %345 = math.tanh %344 : vector<8x128xf32>
    %346 = arith.mulf %341, %345 : vector<8x128xf32>
    %c5_i32_46 = arith.constant 5 : i32
    %347 = vector.broadcast %c5_i32_46 : i32 to vector<1x128xi32>
    %348 = arith.cmpi sgt, %9, %347 : vector<1x128xi32>
    %c2_i32_47 = arith.constant 2 : i32
    %349 = vector.broadcast %c2_i32_47 : i32 to vector<1x128xi32>
    %350 = arith.cmpi sgt, %9, %349 : vector<1x128xi32>
    %351 = vector.shape_cast %348 : vector<1x128xi1> to vector<1x128xi1>
    %352 = vector.broadcast %351 : vector<1x128xi1> to vector<8x128xi1>
    %353 = arith.select %352, %327, %295 : vector<8x128xi1>, vector<8x128xf32>
    %354 = vector.shape_cast %348 : vector<1x128xi1> to vector<1x128xi1>
    %355 = vector.broadcast %354 : vector<1x128xi1> to vector<8x128xi1>
    %356 = arith.select %355, %325, %298 : vector<8x128xi1>, vector<8x128xf32>
    %357 = vector.shape_cast %350 : vector<1x128xi1> to vector<1x128xi1>
    %358 = vector.broadcast %357 : vector<1x128xi1> to vector<8x128xi1>
    %359 = arith.select %358, %346, %301 : vector<8x128xi1>, vector<8x128xf32>
    %360 = vector.shape_cast %350 : vector<1x128xi1> to vector<1x128xi1>
    %361 = vector.broadcast %360 : vector<1x128xi1> to vector<8x128xi1>
    %362 = arith.select %361, %344, %304 : vector<8x128xi1>, vector<8x128xf32>
    %363 = vector.extract_strided_slice %7 {offsets = [0, 768], sizes = [32, 128], strides = [1, 1]} : vector<32x1024xf32> to vector<32x128xf32>
    %364 = vector.extract_strided_slice %8 {offsets = [0, 128], sizes = [32, 128], strides = [1, 1]} : vector<32x1024xf32> to vector<32x128xf32>
    %365 = tpu.concatenate %353, %359 in 0 : vector<8x128xf32>, vector<8x128xf32> -> vector<16x128xf32>
    %cst_48 = arith.constant dense<0.000000e+00> : vector<64x128xf32>
    %366 = tpu.matmul %10, %365, %cst_48 {dimension_numbers = #tpu.dot_dimension_numbers<[1], [0], [0], [1], [0, 0, 1, 1], [], []>} : vector<64x16xf32>, vector<16x128xf32>, vector<64x128xf32> -> vector<64x128xf32>
    %367 = vector.extract_strided_slice %366 {offsets = [0, 0], sizes = [32, 128], strides = [1, 1]} : vector<64x128xf32> to vector<32x128xf32>
    %368 = arith.addf %367, %363 : vector<32x128xf32>
    %369 = vector.extract_strided_slice %368 {offsets = [0, 0], sizes = [24, 128], strides = [1, 1]} : vector<32x128xf32> to vector<24x128xf32>
    %cst_49 = arith.constant 0.000000e+00 : f32
    %370 = vector.broadcast %cst_49 : f32 to vector<24x128xf32>
    %371 = arith.subf %370, %369 : vector<24x128xf32>
    %372 = math.exp %371 : vector<24x128xf32>
    %cst_50 = arith.constant 1.000000e+00 : f32
    %373 = vector.broadcast %cst_50 : f32 to vector<24x128xf32>
    %374 = arith.addf %373, %372 : vector<24x128xf32>
    %375 = tpu.reciprocal %374 : vector<24x128xf32> -> vector<24x128xf32>
    %376 = vector.extract_strided_slice %368 {offsets = [24, 0], sizes = [8, 128], strides = [1, 1]} : vector<32x128xf32> to vector<8x128xf32>
    %377 = math.tanh %376 : vector<8x128xf32>
    %378 = vector.extract_strided_slice %375 {offsets = [0, 0], sizes = [8, 128], strides = [1, 1]} : vector<24x128xf32> to vector<8x128xf32>
    %379 = vector.extract_strided_slice %375 {offsets = [8, 0], sizes = [8, 128], strides = [1, 1]} : vector<24x128xf32> to vector<8x128xf32>
    %380 = vector.extract_strided_slice %375 {offsets = [16, 0], sizes = [8, 128], strides = [1, 1]} : vector<24x128xf32> to vector<8x128xf32>
    %381 = arith.mulf %379, %356 : vector<8x128xf32>
    %382 = arith.mulf %378, %377 : vector<8x128xf32>
    %383 = arith.addf %381, %382 : vector<8x128xf32>
    %384 = math.tanh %383 : vector<8x128xf32>
    %385 = arith.mulf %380, %384 : vector<8x128xf32>
    %386 = vector.extract_strided_slice %366 {offsets = [32, 0], sizes = [32, 128], strides = [1, 1]} : vector<64x128xf32> to vector<32x128xf32>
    %387 = arith.addf %386, %364 : vector<32x128xf32>
    %388 = vector.extract_strided_slice %387 {offsets = [0, 0], sizes = [24, 128], strides = [1, 1]} : vector<32x128xf32> to vector<24x128xf32>
    %cst_51 = arith.constant 0.000000e+00 : f32
    %389 = vector.broadcast %cst_51 : f32 to vector<24x128xf32>
    %390 = arith.subf %389, %388 : vector<24x128xf32>
    %391 = math.exp %390 : vector<24x128xf32>
    %cst_52 = arith.constant 1.000000e+00 : f32
    %392 = vector.broadcast %cst_52 : f32 to vector<24x128xf32>
    %393 = arith.addf %392, %391 : vector<24x128xf32>
    %394 = tpu.reciprocal %393 : vector<24x128xf32> -> vector<24x128xf32>
    %395 = vector.extract_strided_slice %387 {offsets = [24, 0], sizes = [8, 128], strides = [1, 1]} : vector<32x128xf32> to vector<8x128xf32>
    %396 = math.tanh %395 : vector<8x128xf32>
    %397 = vector.extract_strided_slice %394 {offsets = [0, 0], sizes = [8, 128], strides = [1, 1]} : vector<24x128xf32> to vector<8x128xf32>
    %398 = vector.extract_strided_slice %394 {offsets = [8, 0], sizes = [8, 128], strides = [1, 1]} : vector<24x128xf32> to vector<8x128xf32>
    %399 = vector.extract_strided_slice %394 {offsets = [16, 0], sizes = [8, 128], strides = [1, 1]} : vector<24x128xf32> to vector<8x128xf32>
    %400 = arith.mulf %398, %362 : vector<8x128xf32>
    %401 = arith.mulf %397, %396 : vector<8x128xf32>
    %402 = arith.addf %400, %401 : vector<8x128xf32>
    %403 = math.tanh %402 : vector<8x128xf32>
    %404 = arith.mulf %399, %403 : vector<8x128xf32>
    %c6_i32_53 = arith.constant 6 : i32
    %405 = vector.broadcast %c6_i32_53 : i32 to vector<1x128xi32>
    %406 = arith.cmpi sgt, %9, %405 : vector<1x128xi32>
    %c1_i32_54 = arith.constant 1 : i32
    %407 = vector.broadcast %c1_i32_54 : i32 to vector<1x128xi32>
    %408 = arith.cmpi sgt, %9, %407 : vector<1x128xi32>
    %409 = vector.shape_cast %406 : vector<1x128xi1> to vector<1x128xi1>
    %410 = vector.broadcast %409 : vector<1x128xi1> to vector<8x128xi1>
    %411 = arith.select %410, %385, %353 : vector<8x128xi1>, vector<8x128xf32>
    %412 = vector.shape_cast %406 : vector<1x128xi1> to vector<1x128xi1>
    %413 = vector.broadcast %412 : vector<1x128xi1> to vector<8x128xi1>
    %414 = arith.select %413, %383, %356 : vector<8x128xi1>, vector<8x128xf32>
    %415 = vector.shape_cast %408 : vector<1x128xi1> to vector<1x128xi1>
    %416 = vector.broadcast %415 : vector<1x128xi1> to vector<8x128xi1>
    %417 = arith.select %416, %404, %359 : vector<8x128xi1>, vector<8x128xf32>
    %418 = vector.shape_cast %408 : vector<1x128xi1> to vector<1x128xi1>
    %419 = vector.broadcast %418 : vector<1x128xi1> to vector<8x128xi1>
    %420 = arith.select %419, %402, %362 : vector<8x128xi1>, vector<8x128xf32>
    %421 = vector.extract_strided_slice %7 {offsets = [0, 896], sizes = [32, 128], strides = [1, 1]} : vector<32x1024xf32> to vector<32x128xf32>
    %422 = vector.extract_strided_slice %8 {offsets = [0, 0], sizes = [32, 128], strides = [1, 1]} : vector<32x1024xf32> to vector<32x128xf32>
    %423 = tpu.concatenate %411, %417 in 0 : vector<8x128xf32>, vector<8x128xf32> -> vector<16x128xf32>
    %cst_55 = arith.constant dense<0.000000e+00> : vector<64x128xf32>
    %424 = tpu.matmul %10, %423, %cst_55 {dimension_numbers = #tpu.dot_dimension_numbers<[1], [0], [0], [1], [0, 0, 1, 1], [], []>} : vector<64x16xf32>, vector<16x128xf32>, vector<64x128xf32> -> vector<64x128xf32>
    %425 = vector.extract_strided_slice %424 {offsets = [0, 0], sizes = [32, 128], strides = [1, 1]} : vector<64x128xf32> to vector<32x128xf32>
    %426 = arith.addf %425, %421 : vector<32x128xf32>
    %427 = vector.extract_strided_slice %426 {offsets = [0, 0], sizes = [24, 128], strides = [1, 1]} : vector<32x128xf32> to vector<24x128xf32>
    %cst_56 = arith.constant 0.000000e+00 : f32
    %428 = vector.broadcast %cst_56 : f32 to vector<24x128xf32>
    %429 = arith.subf %428, %427 : vector<24x128xf32>
    %430 = math.exp %429 : vector<24x128xf32>
    %cst_57 = arith.constant 1.000000e+00 : f32
    %431 = vector.broadcast %cst_57 : f32 to vector<24x128xf32>
    %432 = arith.addf %431, %430 : vector<24x128xf32>
    %433 = tpu.reciprocal %432 : vector<24x128xf32> -> vector<24x128xf32>
    %434 = vector.extract_strided_slice %426 {offsets = [24, 0], sizes = [8, 128], strides = [1, 1]} : vector<32x128xf32> to vector<8x128xf32>
    %435 = math.tanh %434 : vector<8x128xf32>
    %436 = vector.extract_strided_slice %433 {offsets = [0, 0], sizes = [8, 128], strides = [1, 1]} : vector<24x128xf32> to vector<8x128xf32>
    %437 = vector.extract_strided_slice %433 {offsets = [8, 0], sizes = [8, 128], strides = [1, 1]} : vector<24x128xf32> to vector<8x128xf32>
    %438 = vector.extract_strided_slice %433 {offsets = [16, 0], sizes = [8, 128], strides = [1, 1]} : vector<24x128xf32> to vector<8x128xf32>
    %439 = arith.mulf %437, %414 : vector<8x128xf32>
    %440 = arith.mulf %436, %435 : vector<8x128xf32>
    %441 = arith.addf %439, %440 : vector<8x128xf32>
    %442 = math.tanh %441 : vector<8x128xf32>
    %443 = arith.mulf %438, %442 : vector<8x128xf32>
    %444 = vector.extract_strided_slice %424 {offsets = [32, 0], sizes = [32, 128], strides = [1, 1]} : vector<64x128xf32> to vector<32x128xf32>
    %445 = arith.addf %444, %422 : vector<32x128xf32>
    %446 = vector.extract_strided_slice %445 {offsets = [0, 0], sizes = [24, 128], strides = [1, 1]} : vector<32x128xf32> to vector<24x128xf32>
    %cst_58 = arith.constant 0.000000e+00 : f32
    %447 = vector.broadcast %cst_58 : f32 to vector<24x128xf32>
    %448 = arith.subf %447, %446 : vector<24x128xf32>
    %449 = math.exp %448 : vector<24x128xf32>
    %cst_59 = arith.constant 1.000000e+00 : f32
    %450 = vector.broadcast %cst_59 : f32 to vector<24x128xf32>
    %451 = arith.addf %450, %449 : vector<24x128xf32>
    %452 = tpu.reciprocal %451 : vector<24x128xf32> -> vector<24x128xf32>
    %453 = vector.extract_strided_slice %445 {offsets = [24, 0], sizes = [8, 128], strides = [1, 1]} : vector<32x128xf32> to vector<8x128xf32>
    %454 = math.tanh %453 : vector<8x128xf32>
    %455 = vector.extract_strided_slice %452 {offsets = [0, 0], sizes = [8, 128], strides = [1, 1]} : vector<24x128xf32> to vector<8x128xf32>
    %456 = vector.extract_strided_slice %452 {offsets = [8, 0], sizes = [8, 128], strides = [1, 1]} : vector<24x128xf32> to vector<8x128xf32>
    %457 = vector.extract_strided_slice %452 {offsets = [16, 0], sizes = [8, 128], strides = [1, 1]} : vector<24x128xf32> to vector<8x128xf32>
    %458 = arith.mulf %456, %420 : vector<8x128xf32>
    %459 = arith.mulf %455, %454 : vector<8x128xf32>
    %460 = arith.addf %458, %459 : vector<8x128xf32>
    %461 = math.tanh %460 : vector<8x128xf32>
    %462 = arith.mulf %457, %461 : vector<8x128xf32>
    %c7_i32_60 = arith.constant 7 : i32
    %463 = vector.broadcast %c7_i32_60 : i32 to vector<1x128xi32>
    %464 = arith.cmpi sgt, %9, %463 : vector<1x128xi32>
    %c0_i32_61 = arith.constant 0 : i32
    %465 = vector.broadcast %c0_i32_61 : i32 to vector<1x128xi32>
    %466 = arith.cmpi sgt, %9, %465 : vector<1x128xi32>
    %467 = vector.shape_cast %464 : vector<1x128xi1> to vector<1x128xi1>
    %468 = vector.broadcast %467 : vector<1x128xi1> to vector<8x128xi1>
    %469 = arith.select %468, %443, %411 : vector<8x128xi1>, vector<8x128xf32>
    %470 = vector.shape_cast %466 : vector<1x128xi1> to vector<1x128xi1>
    %471 = vector.broadcast %470 : vector<1x128xi1> to vector<8x128xi1>
    %472 = arith.select %471, %462, %417 : vector<8x128xi1>, vector<8x128xf32>
    %473 = tpu.transpose %469, [1, 0] : vector<8x128xf32> -> vector<128x8xf32>
    %474 = tpu.transpose %472, [1, 0] : vector<8x128xf32> -> vector<128x8xf32>
    %c0_62 = arith.constant 0 : index
    %c0_63 = arith.constant 0 : index
    %475 = vector.load %arg3[%c0_62, %c0_63] : memref<128x32xf32, #tpu.memory_space<vmem>>, vector<128x32xf32>
    %cst_64 = arith.constant 0.000000e+00 : f32
    %476 = vector.broadcast %cst_64 : f32 to vector<128x80xf32>
    %477 = tpu.concatenate %475, %473, %474, %476 in 1 : vector<128x32xf32>, vector<128x8xf32>, vector<128x8xf32>, vector<128x80xf32> -> vector<128x128xf32>
    %c0_65 = arith.constant 0 : index
    %c0_66 = arith.constant 0 : index
    %478 = vector.load %arg7[%c0_65, %c0_66] : memref<128x128xf32, #tpu.memory_space<vmem>>, vector<128x128xf32>
    tpu.vector_store %arg7[%c0_65, %c0_66], %477 {strides = array<i32>} : memref<128x128xf32, #tpu.memory_space<vmem>>, vector<128x128xf32>,
    return
  }
  func.func @transform_0(%arg0: i32) -> (i32, i32, i32) {
    %c0_i32 = arith.constant 0 : i32
    %c0_i32_0 = arith.constant 0 : i32
    %c0_i32_1 = arith.constant 0 : i32
    return %c0_i32, %c0_i32_0, %arg0 : i32, i32, i32
  }
  func.func @transform_1(%arg0: i32) -> (i32, i32) {
    %c0_i32 = arith.constant 0 : i32
    %c0_i32_0 = arith.constant 0 : i32
    return %c0_i32, %arg0 : i32, i32
  }
  func.func @transform_2(%arg0: i32) -> (i32, i32) {
    %c0_i32 = arith.constant 0 : i32
    %c0_i32_0 = arith.constant 0 : i32
    return %arg0, %c0_i32 : i32, i32
  }
  func.func @transform_3(%arg0: i32) -> (i32, i32) {
    %c0_i32 = arith.constant 0 : i32
    %c0_i32_0 = arith.constant 0 : i32
    %c0_i32_1 = arith.constant 0 : i32
    return %c0_i32, %c0_i32_0 : i32, i32
  }
  func.func @transform_4(%arg0: i32) -> (i32, i32) {
    %c0_i32 = arith.constant 0 : i32
    %c0_i32_0 = arith.constant 0 : i32
    %c0_i32_1 = arith.constant 0 : i32
    return %c0_i32, %c0_i32_0 : i32, i32
  }
  func.func @transform_5(%arg0: i32) -> (i32, i32) {
    %c0_i32 = arith.constant 0 : i32
    %c0_i32_0 = arith.constant 0 : i32
    %c0_i32_1 = arith.constant 0 : i32
    return %c0_i32, %c0_i32_0 : i32, i32
  }
  func.func @transform_6(%arg0: i32) -> (i32, i32) {
    %c0_i32 = arith.constant 0 : i32
    %c0_i32_0 = arith.constant 0 : i32
    return %arg0, %c0_i32 : i32, i32
  }
}

</mosaic_0001>

<bundles_post_ra>
// kernel: tpu_custom_call.1
= control target key start
LH: loop header
LB: loop body
LE: loop exit
PB: predicated region body
PF: predicated region fallthrough
CT: control target
= control target key end

     0   :  { %vm119_vm0 = vcmask 64512   ;;  %v2859_v7 = vmov 0.0   ;;  %v3953_v18 = vmov 0   ;;  %s3946_s0 = inlined_call_operand.vmem [shape: f32[8,8,128], index: 0, kind: input, shape index: {}]   ;;  %s3947_s1 = inlined_call_operand.vmem [shape: s32[1,128], index: 1, kind: input, shape index: {}]   ;;  %s3948_s2 = inlined_call_operand.vmem [shape: f32[128,32], index: 2, kind: input, shape index: {}]   ;;  %s3949_s3 = inlined_call_operand.vmem [shape: f32[64,8], index: 3, kind: input, shape index: {}]   ;;  %s3950_s4 = inlined_call_operand.vmem [shape: f32[64,16], index: 4, kind: input, shape index: {}]   ;;  %s3951_s5 = inlined_call_operand.vmem [shape: f32[64,1], index: 5, kind: input, shape index: {}]   ;;  %s3952_s6 = inlined_call_operand.hbm [shape: f32[128,128], index: 6, kind: output, shape index: {}]  }
   0x1   :  { %v2247_v0 = vld [vmem:[%s3946_s0 + $0x1] ss:$8 sm:$0xf]  ;;  %v24_v3 = vld [vmem:[%s3946_s0] ss:$8 sm:$0xf]  ;;  %208 = vmatprep.mubr.f32.mxu0 %v2859_v7  ;;  %321 = vmatprep.mubr.f32.mxu1 %v2859_v7 }
   0x2   :  { %v2248_v1 = vld [vmem:[%s3946_s0 + $0x1] ss:$8 sm:$0xf0]  ;;  %v25_v4 = vld [vmem:[%s3946_s0] ss:$8 sm:$0xf0]  ;;  %2572 = vset.pattern.permute.xlu1 %v3953_v18  ;;  %2571 = vset.pattern.permute.xlu0 %v3953_v18 }
   0x3   :  { %v30_v2 = vor.u32 %v2248_v1, %v2247_v0  ;;  %v26_v5 = vor.u32 %v25_v4, %v24_v3  ;;  %v2916_v6 = vld [vmem:[%s3949_s3] sm:$0xff]  ;;  %v2938_v14 = vld [vmem:[%s3949_s3 + $0x8] sm:$0xff]  ;;  %v2972_v25 = vld [vmem:[%s3949_s3 + $0x10] sm:$0xff] }
   0x4   :  { %v2251_v8 = vld [vmem:[%s3946_s0 + $0x3] ss:$8 sm:$0xf]  ;;  %v2249_v11 = vld [vmem:[%s3946_s0 + $0x2] ss:$8 sm:$0xf] }
   0x5   :  { %174 = vmatprep.subr.mxu0 %v30_v2  ;;  %v2252_v9 = vld [vmem:[%s3946_s0 + $0x3] ss:$8 sm:$0xf0]  ;;  %v2250_v12 = vld [vmem:[%s3946_s0 + $0x2] ss:$8 sm:$0xf0] }
   0x6   :  { %175 = vmatpush1.msra.mxu0 %v26_v5  ;;  %v38_v10 = vor.u32 %v2252_v9, %v2251_v8  ;;  %v34_v13 = vor.u32 %v2250_v12, %v2249_v11  ;;  %v2255_v15 = vld [vmem:[%s3946_s0 + $0x5] ss:$8 sm:$0xf]  ;;  %v2253_v17 = vld [vmem:[%s3946_s0 + $0x4] ss:$8 sm:$0xf] }
   0x7   :  { %2261 = vmatmul.mubr.msk.f32.vlgmr.msra.gmra.mxu0 %vm119_vm0, %v2916_v6  ;;  %v2256_v16 = vld [vmem:[%s3946_s0 + $0x5] ss:$8 sm:$0xf0]  ;;  %v2254_v20 = vld [vmem:[%s3946_s0 + $0x4] ss:$8 sm:$0xf0] }
   0x8   :  { %214 = vmatprep.mubr.f32.mxu0 %v2859_v7  ;;  %287 = vmatprep.subr.mxu1 %v38_v10  ;;  %v46_v19 = vor.u32 %v2256_v16, %v2255_v15  ;;  %v2259_v21 = vld [vmem:[%s3946_s0 + $0x7] ss:$8 sm:$0xf]  ;;  %v42_v22 = vor.u32 %v2254_v20, %v2253_v17  ;;  %v2257_v24 = vld [vmem:[%s3946_s0 + $0x6] ss:$8 sm:$0xf] }
   0x9   :  { %288 = vmatpush1.msra.mxu1 %v34_v13  ;;  %v2260_v23 = vld [vmem:[%s3946_s0 + $0x7] ss:$8 sm:$0xf0]  ;;  %v2258_v27 = vld [vmem:[%s3946_s0 + $0x6] ss:$8 sm:$0xf0] }
   0xa   :  { %2269 = vmatmul.mubr.msk.f32.vlgmr.msra.gmra.mxu1 %vm119_vm0, %v2916_v6  ;;  %400 = vmatprep.subr.mxu0 %v46_v19  ;;  %v54_v26 = vor.u32 %v2260_v23, %v2259_v21  ;;  %v50_v28 = vor.u32 %v2258_v27, %v2257_v24  ;;  %v71_v29 = vld [vmem:[%s3951_s5] sm:$0xff]  ;;  %v66_v30 = vld [vmem:[%s3949_s3 + $0x18] sm:$0xff] }
   0xb   :  { %2262 = vmatmul.mubr.msk.f32.gmra.mxu0 %vm119_vm0, %v2938_v14  ;;  %327 = vmatprep.mubr.f32.mxu1 %v2859_v7  ;;  %v75_v31 = vld [vmem:[%s3951_s5 + $0x20] sm:$0xff] }
   0xc   :  { %220 = vmatprep.mubr.f32.mxu0 %v2859_v7  ;;  %401 = vmatpush1.msra.mxu0 %v42_v22 }
   0xd   :  { %513 = vmatprep.subr.mxu1 %v54_v26  ;;  %2438 = vmatprep.subr.mxu0 %v2859_v7 }
   0xe   :  { %2270 = vmatmul.mubr.msk.f32.gmra.mxu1 %vm119_vm0, %v2938_v14  ;;  %81 = vperm.xlu1 %2572, %v71_v29  }
   0xf   :  { %2263 = vmatmul.mubr.msk.f32.gmra.mxu0 %vm119_vm0, %v2972_v25  ;;  %333 = vmatprep.mubr.f32.mxu1 %v2859_v7 }
  0x10   :  { %226 = vmatprep.mubr.f32.mxu0 %v2859_v7  ;;  %514 = vmatpush1.msra.mxu1 %v50_v28 }
  0x11   :  { %11 = vsyncpa [#allocation3], 0  ;;  %v72_v32 = vld [vmem:[%s3951_s5 + $0x8] sm:$0xff]  ;;  %101 = vperm.xlu0 %2571, %v75_v31   ;;  %v67_v34 = vld [vmem:[%s3949_s3 + $0x20] sm:$0xff]  ;;  %vm605_vm1 = vcmask 130048   ;;  %s2862_s15 = smov 40  }
  0x12   :  { %2271 = vmatmul.mubr.msk.f32.gmra.mxu1 %vm119_vm0, %v2972_v25  ;;  %v76_v33 = vld [vmem:[%s3951_s5 + $0x28] sm:$0xff]  ;;  %86 = vperm.xlu1 %2572, %v72_v32   ;;  %v73_v35 = vld [vmem:[%s3951_s5 + $0x10] sm:$0xff]  ;;  %v74_v38 = vld [vmem:[%s3951_s5 + $0x18] sm:$0xff]  ;;  %s2863_s19 = smov [#allocation2]  }
  0x13   :  { %2264 = vmatmul.mubr.msk.f32.gmra.mxu0 %vm119_vm0, %v66_v30  ;;  %339 = vmatprep.mubr.f32.mxu1 %v2859_v7  ;;  %v77_v36 = vld [vmem:[%s3951_s5 + $0x30] sm:$0xff]  ;;  %v68_v37 = vld [vmem:[%s3949_s3 + $0x28] sm:$0xff]  ;;  %v78_v39 = vld [vmem:[%s3951_s5 + $0x38] sm:$0xff]  ;;  %s2236_s20 = sshll.u32 %s2863_s19, 4  ;;  %s2237_s20 = int_to_ptr.vmem [resolvable:$true] %s2236_s20 }
  0x14   :  { %232 = vmatprep.mubr.f32.mxu0 %v2859_v7  ;;  %v69_v40 = vld [vmem:[%s3949_s3 + $0x30] sm:$0xff]  ;;  %v70_v41 = vld [vmem:[%s3949_s3 + $0x38] sm:$0xff]  ;;  %v3082_v42 = vld [vmem:[%s3950_s4] sm:$0xff]  ;;  %p2842_p1 = scmp.lt.s32.totalorder %s2237_s20, %s2237_s20 }
  0x15   :  { %106 = vperm.xlu0 %2571, %v76_v33   ;;  %v3092_v43 = vld [vmem:[%s3950_s4 + $0x8] sm:$0xff]  ;;  %v3097_v44 = vld [vmem:[%s3950_s4 + $0x10] sm:$0xff]  ;;  %v3109_v45 = vld [vmem:[%s3950_s4 + $0x18] sm:$0xff] }
  0x16   :  { %2272 = vmatmul.mubr.msk.f32.gmra.mxu1 %vm119_vm0, %v66_v30  ;;  %91 = vperm.xlu1 %2572, %v73_v35   ;;  %v3114_v46 = vld [vmem:[%s3950_s4 + $0x20] sm:$0xff]  ;;  %v3123_v47 = vld [vmem:[%s3950_s4 + $0x28] sm:$0xff]  ;;  %v3128_v48 = vld [vmem:[%s3950_s4 + $0x30] sm:$0xff] }
  0x17   :  { %2265 = vmatmul.mubr.msk.f32.gmra.mxu0 %vm119_vm0, %v67_v34  ;;  %345 = vmatprep.mubr.f32.mxu1 %v2859_v7  ;;  %v3137_v49 = vld [vmem:[%s3950_s4 + $0x38] sm:$0xff] }
  0x18   :  { %238 = vmatprep.mubr.f32.mxu0 %v2859_v7 }
  0x19   :  { %111 = vperm.xlu0 %2571, %v77_v36  }
  0x1a   :  { %2273 = vmatmul.mubr.msk.f32.gmra.mxu1 %vm119_vm0, %v67_v34  ;;  %96 = vperm.xlu1 %2572, %v74_v38  }
  0x1b   :  { %2266 = vmatmul.mubr.msk.f32.gmra.mxu0 %vm119_vm0, %v68_v37  ;;  %351 = vmatprep.mubr.f32.mxu1 %v2859_v7 }
  0x1c   :  { %244 = vmatprep.mubr.f32.mxu0 %v2859_v7 }
  0x1d   :  { %116 = vperm.xlu0 %2571, %v78_v39  }
  0x1e   :  { %2274 = vmatmul.mubr.msk.f32.gmra.mxu1 %vm119_vm0, %v68_v37 }
  0x1f   :  { %2267 = vmatmul.mubr.msk.f32.gmra.mxu0 %vm119_vm0, %v69_v40  ;;  %357 = vmatprep.mubr.f32.mxu1 %v2859_v7 }
  0x20   :  { %250 = vmatprep.mubr.f32.mxu0 %v2859_v7 }
  0x22   :  { %2275 = vmatmul.mubr.msk.f32.gmra.mxu1 %vm119_vm0, %v69_v40 }
  0x23   :  { %2268 = vmatmul.mubr.msk.f32.gmra.mxu0 %vm119_vm0, %v70_v41  ;;  %363 = vmatprep.mubr.f32.mxu1 %v2859_v7 }
  0x24   :  { %434 = vmatprep.mubr.f32.mxu0 %v2859_v7 }
  0x26   :  { %2276 = vmatmul.mubr.msk.f32.gmra.mxu1 %vm119_vm0, %v70_v41 }
  0x27   :  { %2277 = vmatmul.mubr.msk.f32.vlgmr.msra.gmra.mxu0 %vm119_vm0, %v2916_v6  ;;  %547 = vmatprep.mubr.f32.mxu1 %v2859_v7 }
  0x28   :  { %440 = vmatprep.mubr.f32.mxu0 %v2859_v7  ;;  %2439 = vmatpush3.msra.mxu0 %v2859_v7 }
  0x2a   :  { %2285 = vmatmul.mubr.msk.f32.vlgmr.msra.gmra.mxu1 %vm119_vm0, %v2916_v6 }
  0x2b   :  { %2278 = vmatmul.mubr.msk.f32.gmra.mxu0 %vm119_vm0, %v2938_v14  ;;  %553 = vmatprep.mubr.f32.mxu1 %v2859_v7 }
  0x2c   :  { %446 = vmatprep.mubr.f32.mxu0 %v2859_v7 }
  0x2e   :  { %2286 = vmatmul.mubr.msk.f32.gmra.mxu1 %vm119_vm0, %v2938_v14 }
  0x2f   :  { %2279 = vmatmul.mubr.msk.f32.gmra.mxu0 %vm119_vm0, %v2972_v25  ;;  %559 = vmatprep.mubr.f32.mxu1 %v2859_v7 }
  0x30   :  { %452 = vmatprep.mubr.f32.mxu0 %v2859_v7 }
  0x32   :  { %2287 = vmatmul.mubr.msk.f32.gmra.mxu1 %vm119_vm0, %v2972_v25 }
  0x33   :  { %2280 = vmatmul.mubr.msk.f32.gmra.mxu0 %vm119_vm0, %v66_v30  ;;  %565 = vmatprep.mubr.f32.mxu1 %v2859_v7 }
  0x34   :  { %458 = vmatprep.mubr.f32.mxu0 %v2859_v7 }
  0x36   :  { %2288 = vmatmul.mubr.msk.f32.gmra.mxu1 %vm119_vm0, %v66_v30 }
  0x37   :  { %2281 = vmatmul.mubr.msk.f32.gmra.mxu0 %vm119_vm0, %v67_v34  ;;  %571 = vmatprep.mubr.f32.mxu1 %v2859_v7 }
  0x38   :  { %464 = vmatprep.mubr.f32.mxu0 %v2859_v7 }
  0x3a   :  { %2289 = vmatmul.mubr.msk.f32.gmra.mxu1 %vm119_vm0, %v67_v34 }
  0x3b   :  { %2282 = vmatmul.mubr.msk.f32.gmra.mxu0 %vm119_vm0, %v68_v37  ;;  %577 = vmatprep.mubr.f32.mxu1 %v2859_v7 }
  0x3c   :  { %470 = vmatprep.mubr.f32.mxu0 %v2859_v7 }
  0x3e   :  { %2290 = vmatmul.mubr.msk.f32.gmra.mxu1 %vm119_vm0, %v68_v37 }
  0x3f   :  { %2283 = vmatmul.mubr.msk.f32.gmra.mxu0 %vm119_vm0, %v69_v40  ;;  %583 = vmatprep.mubr.f32.mxu1 %v2859_v7 }
  0x40   :  { %476 = vmatprep.mubr.f32.mxu0 %v2859_v7 }
  0x42   :  { %2291 = vmatmul.mubr.msk.f32.gmra.mxu1 %vm119_vm0, %v69_v40 }
  0x43   :  { %2284 = vmatmul.mubr.msk.f32.gmra.mxu0 %vm119_vm0, %v70_v41  ;;  %589 = vmatprep.mubr.f32.mxu1 %v2859_v7 }
  0x44   :  { %2440 = vmatprep.mubr.msk.f32.mxu0 %vm605_vm1, %v3082_v42 }
  0x46   :  { %2292 = vmatmul.mubr.msk.f32.gmra.mxu1 %vm119_vm0, %v70_v41 }
  0x47   :  { %2441 = vmatmul.mubr.msk.f32.vlgmr.msra.gmra.mxu0 %vm605_vm1, %v3092_v43  ;;  %2456 = vmatprep.mubr.msk.f32.mxu1 %vm605_vm1, %v3082_v42 }
  0x48   :  { %2443 = vmatprep.mubr.msk.f32.mxu0 %vm605_vm1, %v3097_v44 }
  0x4b   :  { %2444 = vmatmul.mubr.msk.f32.gmra.mxu0 %vm605_vm1, %v3109_v45 }
  0x4c   :  { %2446 = vmatprep.mubr.msk.f32.mxu0 %vm605_vm1, %v3114_v46 }
  0x4f   :  { %2447 = vmatmul.mubr.msk.f32.gmra.mxu0 %vm605_vm1, %v3123_v47 }
  0x50   :  { %2449 = vmatprep.mubr.msk.f32.mxu0 %vm605_vm1, %v3128_v48 }
  0x53   :  { %2450 = vmatmul.mubr.msk.f32.gmra.mxu0 %vm605_vm1, %v3137_v49 }
  0x54   :  { %2472 = vmatprep.mubr.msk.f32.mxu0 %vm605_vm1, %v3082_v42 }
  0x89   :  { %v3241_v37 = vpop.permute.xlu1 %81 }
  0xc7   :  { %v3143_v50 = vpop.f32.mrf.mxu0 }
  0xc9   :  { %v3145_v51 = vpop.f32.mrf.mxu0 }
  0xca   :  { %v3147_v52 = vpop.f32.mrf.mxu1 }
  0xcb   :  { %v216_v53 = vpop.f32.mrf.mxu0 }
  0xcc   :  { %v3149_v54 = vpop.f32.mrf.mxu1 }
  0xcd   :  { %v3151_v55 = vpop.f32.mrf.mxu0 }
  0xce   :  { %v3153_v56 = vpop.f32.mrf.mxu1 }
  0xcf   :  { %v3155_v57 = vpop.f32.mrf.mxu0 }
  0xd0   :  { %v3157_v58 = vpop.f32.mrf.mxu1 }
  0xd1   :  { %v3159_v59 = vpop.f32.mrf.mxu0 }
  0xd2   :  { %v3161_v60 = vpop.f32.mrf.mxu1 }
  0xd3   :  { %v3163_v61 = vpop.f32.mrf.mxu0 }
  0xd4   :  { %v3165_v62 = vpop.f32.mrf.mxu1 }
  0xd5   :  { %v3167_v63 = vpop.f32.mrf.mxu0 }
  0xd6   :  { %v3169_v0 = vpop.f32.mrf.mxu1 }
  0xd7   :  { %v3171_v1 = vpop.f32.mrf.mxu0 }
  0xd8   :  { %3955 = vst [vmem:[#allocation5_spill] sm:$0xff] %v3171_v1  ;;  %v3173_v2 = vpop.f32.mrf.mxu1 }
  0xd9   :  { %v3175_v3 = vpop.f32.mrf.mxu0 }
  0xda   :  { %3956 = vst [vmem:[#allocation6_spill] sm:$0xff] %v3175_v3  ;;  %v3177_v4 = vpop.f32.mrf.mxu1 }
  0xdb   :  { %3957 = vst [vmem:[#allocation7_spill] sm:$0xff] %v3177_v4  ;;  %v3179_v5 = vpop.f32.mrf.mxu0 }
  0xdc   :  { %3958 = vst [vmem:[#allocation8_spill] sm:$0xff] %v3179_v5  ;;  %v3181_v6 = vpop.f32.mrf.mxu1 }
  0xdd   :  { %3959 = vst [vmem:[#allocation9_spill] sm:$0xff] %v3181_v6  ;;  %v3183_v7 = vpop.f32.mrf.mxu0 }
  0xde   :  { %3960 = vst [vmem:[#allocation10_spill] sm:$0xff] %v3183_v7  ;;  %v3185_v8 = vpop.f32.mrf.mxu1 }
  0xdf   :  { %3961 = vst [vmem:[#allocation11_spill] sm:$0xff] %v3185_v8  ;;  %v3187_v9 = vpop.f32.mrf.mxu0 }
  0xe0   :  { %3962 = vst [vmem:[#allocation12_spill] sm:$0xff] %v3187_v9  ;;  %v3189_v10 = vpop.f32.mrf.mxu1 }
  0xe1   :  { %3963 = vst [vmem:[#allocation13_spill] sm:$0xff] %v3189_v10  ;;  %v3191_v11 = vpop.f32.mrf.mxu0 }
  0xe2   :  { %3964 = vst [vmem:[#allocation14_spill] sm:$0xff] %v3191_v11  ;;  %v3193_v12 = vpop.f32.mrf.mxu1 }
  0xe3   :  { %3965 = vst [vmem:[#allocation15_spill] sm:$0xff] %v3193_v12  ;;  %v3195_v13 = vpop.f32.mrf.mxu0 }
  0xe4   :  { %3966 = vst [vmem:[#allocation16_spill] sm:$0xff] %v3195_v13  ;;  %v3197_v14 = vpop.f32.mrf.mxu1  ;;  %v3253_v13 = vpop.permute.xlu1 %86 }
  0xe5   :  { %3967 = vst [vmem:[#allocation17_spill] sm:$0xff] %v3197_v14  ;;  %v3199_v15 = vpop.f32.mrf.mxu0  ;;  %v217_v5 = vadd.f32 %v216_v53, %v3253_v13 }
  0xe6   :  { %3968 = vst [vmem:[#allocation18_spill] sm:$0xff] %v3199_v15  ;;  %v3201_v16 = vpop.f32.mrf.mxu1 }
  0xe7   :  { %3969 = vst [vmem:[#allocation19_spill] sm:$0xff] %v3201_v16  ;;  %v3203_v17 = vpop.f32.mrf.mxu0 }
  0xe8   :  { %3970 = vst [vmem:[#allocation20_spill] sm:$0xff] %v3203_v17  ;;  %v3205_v19 = vpop.f32.mrf.mxu1 }
  0xe9   :  { %3971 = vst [vmem:[#allocation21_spill] sm:$0xff] %v3205_v19  ;;  %v3207_v20 = vpop.f32.mrf.mxu0 }
  0xea   :  { %3972 = vst [vmem:[#allocation22_spill] sm:$0xff] %v3207_v20  ;;  %v3209_v21 = vpop.f32.mrf.mxu1 }
  0xeb   :  { %3973 = vst [vmem:[#allocation23_spill] sm:$0xff] %v3209_v21  ;;  %v3211_v22 = vpop.f32.mrf.mxu0  ;;  %v3266_v21 = vpop.permute.xlu1 %91 }
  0xec   :  { %3974 = vst [vmem:[#allocation24_spill] sm:$0xff] %v3211_v22  ;;  %v3213_v23 = vpop.f32.mrf.mxu1 }
  0xed   :  { %3975 = vst [vmem:[#allocation25_spill] sm:$0xff] %v3213_v23  ;;  %v3215_v24 = vpop.f32.mrf.mxu0  ;;  %v3260_v23 = vpop.permute.xlu0 %101 }
  0xee   :  { %3976 = vst [vmem:[#allocation26_spill] sm:$0xff] %v3215_v24  ;;  %v3217_v25 = vpop.f32.mrf.mxu1 }
  0xef   :  { %3977 = vst [vmem:[#allocation27_spill] sm:$0xff] %v3217_v25  ;;  %v3219_v26 = vpop.f32.mrf.mxu0 }
  0xf0   :  { %3978 = vst [vmem:[#allocation28_spill] sm:$0xff] %v3219_v26  ;;  %v3221_v27 = vpop.f32.mrf.mxu1 }
  0xf1   :  { %3979 = vst [vmem:[#allocation29_spill] sm:$0xff] %v3221_v27  ;;  %v3223_v28 = vpop.f32.mrf.mxu0  ;;  %v211_v27 = vadd.f32 %v3143_v50, %v3241_v37  ;;  %v3268_v25 = vpop.permute.xlu0 %106  ;;  %v223_v50 = vadd.f32 %v3155_v57, %v3266_v21 }
  0xf2   :  { %3980 = vst [vmem:[#allocation30_spill] sm:$0xff] %v3223_v28  ;;  %v3225_v29 = vpop.f32.mrf.mxu1 }
  0xf3   :  { %3981 = vst [vmem:[#allocation31_spill] sm:$0xff] %v3225_v29  ;;  %v3227_v30 = vpop.f32.mrf.mxu0 }
  0xf4   :  { %3982 = vst [vmem:[#allocation32_spill] sm:$0xff] %v3227_v30  ;;  %v3231_v32 = vpop.f32.mrf.mxu1 }
  0xf5   :  { %v3229_v31 = vpop.f32.mrf.mxu0  ;;  %3984 = vst [vmem:[#allocation34_spill] sm:$0xff] %v3231_v32 }
  0xf6   :  { %3983 = vst [vmem:[#allocation33_spill] sm:$0xff] %v3229_v31  ;;  %v3237_v35 = vpop.f32.mrf.mxu1 }
  0xf7   :  { %v3233_v33 = vpop.f32.mrf.mxu0  ;;  %3985 = vst [vmem:[#allocation35_spill] sm:$0xff] %v3237_v35 }
  0xf8   :  { %v3243_v38 = vpop.f32.mrf.mxu1 }
  0xf9   :  { %v3235_v34 = vpop.f32.mrf.mxu0  ;;  %3986 = vst [vmem:[#allocation36_spill] sm:$0xff] %v3243_v38 }
  0xfa   :  { %v3249_v41 = vpop.f32.mrf.mxu1 }
  0xfb   :  { %v3239_v36 = vpop.f32.mrf.mxu0 }
  0xfc   :  { %v575_v1 = vpop.f32.mrf.mxu1 }
  0xfd   :  { %v3245_v39 = vpop.f32.mrf.mxu0 }
  0xfe   :  { %v3264_v35 = vpop.f32.mrf.mxu1 }
  0xff   :  { %v3247_v40 = vpop.f32.mrf.mxu0  ;;  %v580_v26 = vadd.f32 %v3264_v35, %v3268_v25 }
 0x100   :  { %v581_v53 = vpop.f32.mrf.mxu1 }
 0x101   :  { %v3251_v18 = vpop.f32.mrf.mxu0  ;;  %v582_v4 = vadd.f32 %v581_v53, %v3268_v25  ;;  %v3276_v53 = vpop.permute.xlu1 %96 }
 0x102   :  { %v3274_v8 = vpop.f32.mrf.mxu1 }
 0x103   :  { %v3255_v9 = vpop.f32.mrf.mxu0 }
 0x104   :  { %3987 = vst [vmem:[#allocation37_spill] sm:$0xff] %v3255_v9  ;;  %v587_v57 = vpop.f32.mrf.mxu1 }
 0x105   :  { %v3257_v32 = vpop.f32.mrf.mxu0 }
 0x107   :  { %v2442_v38 = vpop.f32.mrf.mxu0 }
 0x108   :  { %v736_v15 = vadd.f32 %v2442_v38, %v217_v5 }
 0x109   :  { %v696_v11 = vpop.f32.mrf.mxu0 }
 0x10a   :  { %v740_v3 = vsub.f32 0.0, %v736_v15  ;;  %v735_v29 = vadd.f32 %v696_v11, %v211_v27  ;;  %v576_v15 = vadd.f32 %v575_v1, %v3260_v23 }
 0x10b   :  { %v2445_v7 = vpop.f32.mrf.mxu0 }
 0x10c   :  { %v744_v16 = vmul.f32 1.442695, %v740_v3  ;;  %v739_v31 = vsub.f32 0.0, %v735_v29 }
 0x10d   :  { %v706_v12 = vpop.f32.mrf.mxu0 }
 0x10e   :  { %2573 = vpow2.f32 %v744_v16  ;;  %v742_v28 = vmul.f32 1.442695, %v739_v31  ;;  %v737_v27 = vadd.f32 %v706_v12, %v223_v50  ;;  %v3278_v16 = vpop.permute.xlu0 %111  ;;  %v229_v12 = vadd.f32 %v3163_v61, %v3276_v53 }
 0x10f   :  { %v2448_v5 = vpop.f32.mrf.mxu0 }
 0x110   :  { %2575 = vpow2.f32 %v742_v28  ;;  %v761_v11 = vadd.f32 %v2448_v5, %v582_v4  ;;  %v741_v31 = vsub.f32 0.0, %v737_v27  ;;  %v588_v4 = vadd.f32 %v587_v57, %v3278_v16  ;;  %v3283_v5 = vpop.f32.mrf.mxu1 }
 0x111   :  { %v716_v38 = vpop.f32.mrf.mxu0 }
 0x112   :  { %v765_v3 = vsub.f32 0.0, %v761_v11  ;;  %v760_v29 = vadd.f32 %v716_v38, %v576_v15  ;;  %v746_v28 = vmul.f32 1.442695, %v741_v31  ;;  %v738_v11 = vadd.f32 %v2445_v7, %v229_v12 }
 0x113   :  { %v2451_v20 = vpop.f32.mrf.mxu0 }
 0x114   :  { %v769_v24 = vmul.f32 1.442695, %v765_v3  ;;  %v764_v19 = vsub.f32 0.0, %v760_v29  ;;  %v3285_v29 = vpop.permute.xlu0 %116 }
 0x115   :  { %v726_v1 = vpop.f32.mrf.mxu0 }
 0x116   :  { %2577 = vpow2.f32 %v769_v24  ;;  %v767_v30 = vmul.f32 1.442695, %v764_v19  ;;  %v762_v50 = vadd.f32 %v726_v1, %v588_v4  ;;  %v593_v19 = vpop.f32.mrf.mxu1 }
 0x118   :  { %2579 = vpow2.f32 %v767_v30  ;;  %v766_v27 = vsub.f32 0.0, %v762_v50  ;;  %v594_v30 = vadd.f32 %v593_v19, %v3285_v29 }
 0x119   :  { %2581 = vpow2.f32 %v746_v28 }
 0x11a   :  { %v771_v61 = vmul.f32 1.442695, %v766_v27  ;;  %v763_v57 = vadd.f32 %v2451_v20, %v594_v30 }
 0x11b   :  { %v2574_v15 = vpop.eup %2573 }
 0x11c   :  { %v749_v38 = vadd.f32 1.0, %v2574_v15 }
 0x11d   :  { %v2576_v3 = vpop.eup %2575 }
 0x11e   :  { %2583 = vrcp.f32 %v749_v38  ;;  %v748_v24 = vadd.f32 1.0, %v2576_v3 }
 0x11f   :  { %2585 = vtanh.f32 %v738_v11 }
 0x120   :  { %2587 = vrcp.f32 %v748_v24 }
 0x121   :  { %2589 = vpow2.f32 %v771_v61 }
 0x123   :  { %v2578_v31 = vpop.eup %2577 }
 0x124   :  { %v774_v1 = vadd.f32 1.0, %v2578_v31 }
 0x125   :  { %v2580_v4 = vpop.eup %2579 }
 0x126   :  { %2591 = vrcp.f32 %v774_v1  ;;  %v773_v7 = vadd.f32 1.0, %v2580_v4  ;;  %v2582_v12 = vpop.eup %2581  ;;  %v788_v4 = vlaneseq }
 0x127   :  { %2593 = vtanh.f32 %v763_v57  ;;  %v750_v11 = vadd.f32 1.0, %v2582_v12  ;;  %v3297_v12 = vld [vmem:[%s3947_s1] sm:$0x1] }
 0x128   :  { %2595 = vrcp.f32 %v773_v7  ;;  %vm786_vm2 = vcmp.gt.s32.totalorder %v3297_v12, 7  ;;  %vm785_vm3 = vcmp.gt.s32.totalorder %v3297_v12, 0  ;;  %vm958_vm6 = vcmp.gt.s32.totalorder %v3297_v12, 1 }
 0x129   :  { %2597 = vrcp.f32 %v750_v11  ;;  %v3988_v11 = vmov 0   ;;  %vm959_vm7 = vcmp.gt.s32.totalorder %v3297_v12, 6  ;;  %vm1131_vm10 = vcmp.gt.s32.totalorder %v3297_v12, 2 }
 0x12a   :  { %vm1132_vm11 = vcmp.gt.s32.totalorder %v3297_v12, 5  ;;  %vm1304_vm14 = vcmp.gt.s32.totalorder %v3297_v12, 3  ;;  %vm1305_vm15 = vcmp.gt.s32.totalorder %v3297_v12, 4 }
 0x12b   :  { %v2584_v28 = vpop.eup %2583 }
 0x12c   :  { %v2586_v50 = vpop.eup %2585  ;;  %v755_v38 = vmul.f32 0.0, %v2584_v28 }
 0x12d   :  { %v2588_v15 = vpop.eup %2587 }
 0x12e   :  { %v756_v3 = vmul.f32 %v2588_v15, %v2586_v50  ;;  %v2590_v27 = vpop.eup %2589  ;;  %v789_v50 = vshrl.u32 %v788_v4, 7 }
 0x12f   :  { %v775_v61 = vadd.f32 1.0, %v2590_v27  ;;  %v787_v27 = vsel %vm785_vm3, 1, %v3988_v11  ;;  %vm2181_vm3 = vcmask 326656  }
 0x130   :  { %v3288_v24 = vadd.f32 %v756_v3, %v755_v38  ;;  %v795_v38 = vsel %vm786_vm2, 1, %v3988_v11  ;;  %v3304_v3 = vsub.s32 0, %v789_v50  ;;  %v213_v50 = vadd.f32 %v3145_v51, %v3241_v37 }
 0x131   :  { %v574_v51 = vadd.f32 %v3249_v41, %v3260_v23  ;;  %v231_v41 = vadd.f32 %v3167_v63, %v3276_v53 }
 0x132   :  { %2599 = vtanh.f32 %v3288_v24 }
 0x133   :  { %v2592_v20 = vpop.eup %2591  ;;  %2601 = vrcp.f32 %v775_v61  ;;  %v791_v61 = vrot.slane %v787_v27, %v3304_v3 }
 0x134   :  { %v2594_v19 = vpop.eup %2593  ;;  %v780_v31 = vmul.f32 0.0, %v2592_v20  ;;  %v799_v20 = vrot.slane %v795_v38, %v3304_v3 }
 0x135   :  { %v2596_v30 = vpop.eup %2595  ;;  %vm3321_vm5 = vcmp.eq.s32.totalorder %v791_v61, 1 }
 0x136   :  { %v781_v57 = vmul.f32 %v2596_v30, %v2594_v19  ;;  %v2598_v7 = vpop.eup %2597  ;;  %vm3311_vm4 = vcmp.eq.s32.totalorder %v799_v20, 1 }
 0x138   :  { %v3291_v1 = vadd.f32 %v781_v57, %v780_v31 }
 0x13a   :  { %2603 = vtanh.f32 %v3291_v1 }
 0x13f   :  { %v2600_v28 = vpop.eup %2599 }
 0x140   :  { %v3300_v15 = vmul.f32 %v2600_v28, %v2598_v7  ;;  %v2602_v19 = vpop.eup %2601  ;;  %v219_v7 = vadd.f32 %v3151_v55, %v3253_v13  ;;  %v225_v55 = vadd.f32 %v3159_v59, %v3266_v21  ;;  %v586_v59 = vadd.f32 %v3274_v8, %v3278_v16 }
 0x147   :  { %v2604_v30 = vpop.eup %2603 }
 0x148   :  { %v3309_v31 = vmul.f32 %v2604_v30, %v2602_v19 }
 0x14a   :  { %2452 = vmatprep.subr.msk.mxu1 %vm3311_vm4, %v3309_v31 }
 0x14b   :  { %2453 = vmatpush3.msk.msra.mxu1 %vm3311_vm4, %v3309_v31 }
 0x14c   :  { %2454 = vmatprep.subr.msk.mxu1 %vm3321_vm5, %v3300_v15 }
 0x14d   :  { %2455 = vmatpush3.msk.msra.mxu1 %vm3321_vm5, %v3300_v15 }
 0x14e   :  { %2457 = vmatmul.mubr.msk.f32.vlgmr.msra.gmra.mxu1 %vm605_vm1, %v3092_v43 }
 0x14f   :  { %2459 = vmatprep.mubr.msk.f32.mxu1 %vm605_vm1, %v3097_v44 }
 0x152   :  { %2460 = vmatmul.mubr.msk.f32.gmra.mxu1 %vm605_vm1, %v3109_v45 }
 0x153   :  { %2462 = vmatprep.mubr.msk.f32.mxu1 %vm605_vm1, %v3114_v46 }
 0x156   :  { %2463 = vmatmul.mubr.msk.f32.gmra.mxu1 %vm605_vm1, %v3123_v47 }
 0x157   :  { %2465 = vmatprep.mubr.msk.f32.mxu1 %vm605_vm1, %v3128_v48 }
 0x15a   :  { %2466 = vmatmul.mubr.msk.f32.gmra.mxu1 %vm605_vm1, %v3137_v49 }
 0x15b   :  { %2488 = vmatprep.mubr.msk.f32.mxu1 %vm605_vm1, %v3082_v42 }
 0x20e   :  { %v2458_v28 = vpop.f32.mrf.mxu1 }
 0x20f   :  { %v909_v38 = vadd.f32 %v2458_v28, %v219_v7 }
 0x210   :  { %v869_v27 = vpop.f32.mrf.mxu1 }
 0x211   :  { %v913_v20 = vsub.f32 0.0, %v909_v38  ;;  %v908_v19 = vadd.f32 %v869_v27, %v213_v50 }
 0x212   :  { %v2461_v30 = vpop.f32.mrf.mxu1 }
 0x213   :  { %v917_v61 = vmul.f32 1.442695, %v913_v20  ;;  %v912_v14 = vsub.f32 0.0, %v908_v19 }
 0x214   :  { %v879_v6 = vpop.f32.mrf.mxu1 }
 0x215   :  { %2605 = vpow2.f32 %v917_v61  ;;  %v915_v10 = vmul.f32 1.442695, %v912_v14  ;;  %v910_v28 = vadd.f32 %v879_v6, %v225_v55 }
 0x216   :  { %v2464_v17 = vpop.f32.mrf.mxu1 }
 0x217   :  { %2607 = vpow2.f32 %v915_v10  ;;  %v934_v7 = vadd.f32 %v2464_v17, %v580_v26  ;;  %v914_v9 = vsub.f32 0.0, %v910_v28  ;;  %v911_v26 = vadd.f32 %v2461_v30, %v231_v41 }
 0x218   :  { %v889_v50 = vpop.f32.mrf.mxu1  ;;  %v960_v30 = vsel %vm958_vm6, 1, %v3988_v11 }
 0x219   :  { %v938_v38 = vsub.f32 0.0, %v934_v7  ;;  %v933_v27 = vadd.f32 %v889_v50, %v574_v51  ;;  %v919_v10 = vmul.f32 1.442695, %v914_v9 }
 0x21a   :  { %v2467_v20 = vpop.f32.mrf.mxu1 }
 0x21b   :  { %v942_v19 = vmul.f32 1.442695, %v938_v38  ;;  %v937_v22 = vsub.f32 0.0, %v933_v27 }
 0x21c   :  { %v899_v14 = vpop.f32.mrf.mxu1 }
 0x21d   :  { %2609 = vpow2.f32 %v942_v19  ;;  %v940_v35 = vmul.f32 1.442695, %v937_v22  ;;  %v935_v17 = vadd.f32 %v899_v14, %v586_v59  ;;  %v592_v22 = vadd.f32 %v3283_v5, %v3285_v29 }
 0x21e   :  { %v794_v5 = vsel %vm3321_vm5, %v3288_v24, 0.0 }
 0x21f   :  { %2611 = vpow2.f32 %v940_v35  ;;  %v939_v51 = vsub.f32 0.0, %v935_v17  ;;  %v936_v50 = vadd.f32 %v2467_v20, %v592_v22  ;;  %v964_v35 = vrot.slane %v960_v30, %v3304_v3 }
 0x220   :  { %2613 = vpow2.f32 %v919_v10 }
 0x221   :  { %v944_v8 = vmul.f32 1.442695, %v939_v51  ;;  %vm3370_vm8 = vcmp.eq.s32.totalorder %v964_v35, 1  ;;  %v802_v51 = vsel %vm3311_vm4, %v3291_v1, 0.0 }
 0x222   :  { %v2606_v6 = vpop.eup %2605 }
 0x223   :  { %v922_v61 = vadd.f32 1.0, %v2606_v6  ;;  %v968_v6 = vsel %vm959_vm7, 1, %v3988_v11 }
 0x224   :  { %v2608_v55 = vpop.eup %2607 }
 0x225   :  { %2615 = vrcp.f32 %v922_v61  ;;  %v921_v7 = vadd.f32 1.0, %v2608_v55 }
 0x226   :  { %2617 = vtanh.f32 %v911_v26 }
 0x227   :  { %2619 = vrcp.f32 %v921_v7  ;;  %v972_v7 = vrot.slane %v968_v6, %v3304_v3  ;;  %v324_v6 = vadd.f32 %v3147_v52, %v3241_v37  ;;  %v463_v52 = vadd.f32 %v3235_v34, %v3260_v23 }
 0x228   :  { %2621 = vpow2.f32 %v944_v8  ;;  %v342_v34 = vadd.f32 %v3169_v0, %v3276_v53 }
 0x229   :  { %vm3383_vm9 = vcmp.eq.s32.totalorder %v972_v7, 1 }
 0x22a   :  { %v2610_v28 = vpop.eup %2609 }
 0x22b   :  { %v947_v38 = vadd.f32 1.0, %v2610_v28 }
 0x22c   :  { %v2612_v63 = vpop.eup %2611 }
 0x22d   :  { %2623 = vrcp.f32 %v947_v38  ;;  %v946_v9 = vadd.f32 1.0, %v2612_v63  ;;  %v2614_v27 = vpop.eup %2613 }
 0x22e   :  { %2625 = vtanh.f32 %v936_v50  ;;  %v923_v41 = vadd.f32 1.0, %v2614_v27 }
 0x22f   :  { %2627 = vrcp.f32 %v946_v9 }
 0x230   :  { %2629 = vrcp.f32 %v923_v41  ;;  %v801_v41 = vsel %vm3311_vm4, %v3309_v31, 0.0 }
 0x232   :  { %v2616_v19 = vpop.eup %2615 }
 0x233   :  { %v2618_v20 = vpop.eup %2617  ;;  %v928_v14 = vmul.f32 %v2616_v19, %v794_v5 }
 0x234   :  { %v2620_v59 = vpop.eup %2619 }
 0x235   :  { %v929_v10 = vmul.f32 %v2620_v59, %v2618_v20  ;;  %v2622_v61 = vpop.eup %2621 }
 0x236   :  { %v948_v50 = vadd.f32 1.0, %v2622_v61 }
 0x237   :  { %v930_v26 = vadd.f32 %v929_v10, %v928_v14 }
 0x239   :  { %2631 = vtanh.f32 %v930_v26  ;;  %v3377_v24 = vsel %vm3370_vm8, %v930_v26, %v794_v5  ;;  %v793_v5 = vsel %vm3321_vm5, %v3300_v15, 0.0  ;;  %v330_v15 = vadd.f32 %v3153_v56, %v3253_v13 }
 0x23a   :  { %v2624_v55 = vpop.eup %2623  ;;  %2633 = vrcp.f32 %v948_v50  ;;  %v469_v50 = vadd.f32 %v3245_v39, %v3268_v25  ;;  %v336_v56 = vadd.f32 %v3161_v60, %v3266_v21  ;;  %v475_v60 = vadd.f32 %v3251_v18, %v3278_v16 }
 0x23b   :  { %v2626_v22 = vpop.eup %2625  ;;  %v953_v8 = vmul.f32 %v2624_v55, %v802_v51 }
 0x23c   :  { %v2628_v28 = vpop.eup %2627 }
 0x23d   :  { %v954_v38 = vmul.f32 %v2628_v28, %v2626_v22  ;;  %v2630_v27 = vpop.eup %2629 }
 0x23f   :  { %v955_v9 = vadd.f32 %v954_v38, %v953_v8 }
 0x241   :  { %2635 = vtanh.f32 %v955_v9  ;;  %v3389_v30 = vsel %vm3383_vm9, %v955_v9, %v802_v51 }
 0x246   :  { %v2632_v1 = vpop.eup %2631 }
 0x247   :  { %v932_v19 = vmul.f32 %v2632_v1, %v2630_v27  ;;  %v2634_v20 = vpop.eup %2633 }
 0x249   :  { %v3396_v35 = vsel %vm3370_vm8, %v932_v19, %v793_v5 }
 0x24e   :  { %v2636_v14 = vpop.eup %2635 }
 0x24f   :  { %v957_v59 = vmul.f32 %v2636_v14, %v2634_v20 }
 0x251   :  { %v3403_v10 = vsel %vm3383_vm9, %v957_v59, %v801_v41 }
 0x252   :  { %2468 = vmatprep.subr.mxu0 %v3403_v10 }
 0x253   :  { %2469 = vmatpush3.msra.mxu0 %v3403_v10 }
 0x254   :  { %2470 = vmatprep.subr.mxu0 %v3396_v35 }
 0x255   :  { %2471 = vmatpush3.msra.mxu0 %v3396_v35 }
 0x256   :  { %2473 = vmatmul.mubr.msk.f32.vlgmr.msra.gmra.mxu0 %vm605_vm1, %v3092_v43 }
 0x257   :  { %2475 = vmatprep.mubr.msk.f32.mxu0 %vm605_vm1, %v3097_v44 }
 0x25a   :  { %2476 = vmatmul.mubr.msk.f32.gmra.mxu0 %vm605_vm1, %v3109_v45 }
 0x25b   :  { %2478 = vmatprep.mubr.msk.f32.mxu0 %vm605_vm1, %v3114_v46 }
 0x25e   :  { %2479 = vmatmul.mubr.msk.f32.gmra.mxu0 %vm605_vm1, %v3123_v47 }
 0x25f   :  { %2481 = vmatprep.mubr.msk.f32.mxu0 %vm605_vm1, %v3128_v48 }
 0x262   :  { %2482 = vmatmul.mubr.msk.f32.gmra.mxu0 %vm605_vm1, %v3137_v49 }
 0x263   :  { %2504 = vmatprep.mubr.msk.f32.mxu0 %vm605_vm1, %v3082_v42 }
 0x316   :  { %v2474_v31 = vpop.f32.mrf.mxu0 }
 0x317   :  { %v1082_v26 = vadd.f32 %v2474_v31, %v330_v15 }
 0x318   :  { %v1042_v61 = vpop.f32.mrf.mxu0 }
 0x319   :  { %v1086_v55 = vsub.f32 0.0, %v1082_v26  ;;  %v1081_v51 = vadd.f32 %v1042_v61, %v324_v6 }
 0x31a   :  { %v2477_v7 = vpop.f32.mrf.mxu0 }
 0x31b   :  { %v1090_v22 = vmul.f32 1.442695, %v1086_v55  ;;  %v1085_v8 = vsub.f32 0.0, %v1081_v51  ;;  %v1084_v55 = vadd.f32 %v2477_v7, %v342_v34 }
 0x31c   :  { %v1052_v28 = vpop.f32.mrf.mxu0 }
 0x31d   :  { %2637 = vpow2.f32 %v1090_v22  ;;  %v1088_v38 = vmul.f32 1.442695, %v1085_v8  ;;  %v1083_v1 = vadd.f32 %v1052_v28, %v336_v56 }
 0x31e   :  { %v2480_v9 = vpop.f32.mrf.mxu0 }
 0x31f   :  { %2639 = vpow2.f32 %v1088_v38  ;;  %v1107_v27 = vadd.f32 %v2480_v9, %v469_v50  ;;  %v1087_v15 = vsub.f32 0.0, %v1083_v1  ;;  %v481_v50 = vadd.f32 %v3257_v32, %v3285_v29 }
 0x320   :  { %v1062_v19 = vpop.f32.mrf.mxu0 }
 0x321   :  { %v1111_v5 = vsub.f32 0.0, %v1107_v27  ;;  %v1106_v20 = vadd.f32 %v1062_v19, %v463_v52  ;;  %v1092_v6 = vmul.f32 1.442695, %v1087_v15  ;;  %v1133_v52 = vsel %vm1131_vm10, 1, %v3988_v11 }
 0x322   :  { %v2483_v14 = vpop.f32.mrf.mxu0  ;;  %v1137_v19 = vrot.slane %v1133_v52, %v3304_v3  ;;  %v1141_v15 = vsel %vm1132_vm11, 1, %v3988_v11  ;;  %v326_v52 = vadd.f32 %v3149_v54, %v3241_v37  ;;  %v461_v54 = vadd.f32 %v3233_v33, %v3260_v23 }
 0x323   :  { %v1115_v59 = vmul.f32 1.442695, %v1111_v5  ;;  %v1110_v41 = vsub.f32 0.0, %v1106_v20  ;;  %v1109_v56 = vadd.f32 %v2483_v14, %v481_v50  ;;  %v344_v33 = vadd.f32 %v3173_v2, %v3276_v53 }
 0x324   :  { %v1072_v31 = vpop.f32.mrf.mxu0  ;;  %vm3446_vm12 = vcmp.eq.s32.totalorder %v1137_v19, 1 }
 0x325   :  { %2641 = vpow2.f32 %v1115_v59  ;;  %v1113_v39 = vmul.f32 1.442695, %v1110_v41  ;;  %v1108_v26 = vadd.f32 %v1072_v31, %v475_v60  ;;  %v4022_v41 = vld [vmem:[#allocation27_spill] sm:$0xff] }
 0x327   :  { %2643 = vpow2.f32 %v1113_v39  ;;  %v1112_v8 = vsub.f32 0.0, %v1108_v26 }
 0x328   :  { %2645 = vpow2.f32 %v1092_v6  ;;  %v1145_v6 = vrot.slane %v1141_v15, %v3304_v3  ;;  %v467_v15 = vadd.f32 %v3239_v36, %v3268_v25 }
 0x329   :  { %v1117_v18 = vmul.f32 1.442695, %v1112_v8  ;;  %v556_v8 = vadd.f32 %v4022_v41, %v3253_v13 }
 0x32a   :  { %v2638_v61 = vpop.eup %2637  ;;  %vm3458_vm13 = vcmp.eq.s32.totalorder %v1145_v6, 1 }
 0x32b   :  { %v1095_v51 = vadd.f32 1.0, %v2638_v61 }
 0x32c   :  { %v2640_v22 = vpop.eup %2639 }
 0x32d   :  { %2647 = vrcp.f32 %v1095_v51  ;;  %v1094_v28 = vadd.f32 1.0, %v2640_v22 }
 0x32e   :  { %2649 = vtanh.f32 %v1084_v55 }
 0x32f   :  { %2651 = vrcp.f32 %v1094_v28 }
 0x330   :  { %2653 = vpow2.f32 %v1117_v18 }
 0x332   :  { %v2642_v38 = vpop.eup %2641 }
 0x333   :  { %v1120_v9 = vadd.f32 1.0, %v2642_v38 }
 0x334   :  { %v2644_v0 = vpop.eup %2643 }
 0x335   :  { %2655 = vrcp.f32 %v1120_v9  ;;  %v1119_v7 = vadd.f32 1.0, %v2644_v0  ;;  %v2646_v27 = vpop.eup %2645 }
 0x336   :  { %2657 = vtanh.f32 %v1109_v56  ;;  %v1096_v14 = vadd.f32 1.0, %v2646_v27 }
 0x337   :  { %2659 = vrcp.f32 %v1119_v7 }
 0x338   :  { %2661 = vrcp.f32 %v1096_v14 }
 0x33a   :  { %v2648_v1 = vpop.eup %2647 }
 0x33b   :  { %v2650_v5 = vpop.eup %2649  ;;  %v1101_v32 = vmul.f32 %v2648_v1, %v3377_v24 }
 0x33c   :  { %v2652_v20 = vpop.eup %2651 }
 0x33d   :  { %v1102_v59 = vmul.f32 %v2652_v20, %v2650_v5  ;;  %v2654_v31 = vpop.eup %2653 }
 0x33e   :  { %v1121_v51 = vadd.f32 1.0, %v2654_v31 }
 0x33f   :  { %v1103_v39 = vadd.f32 %v1102_v59, %v1101_v32 }
 0x341   :  { %2663 = vtanh.f32 %v1103_v39  ;;  %v3454_v60 = vsel %vm3446_vm12, %v1103_v39, %v3377_v24 }
 0x342   :  { %v2656_v34 = vpop.eup %2655  ;;  %2665 = vrcp.f32 %v1121_v51 }
 0x343   :  { %v2658_v26 = vpop.eup %2657  ;;  %v1126_v61 = vmul.f32 %v2656_v34, %v3389_v30 }
 0x344   :  { %v2660_v55 = vpop.eup %2659 }
 0x345   :  { %v1127_v22 = vmul.f32 %v2660_v55, %v2658_v26  ;;  %v2662_v50 = vpop.eup %2661 }
 0x347   :  { %v1128_v28 = vadd.f32 %v1127_v22, %v1126_v61 }
 0x349   :  { %2667 = vtanh.f32 %v1128_v28  ;;  %v3465_v24 = vsel %vm3458_vm13, %v1128_v28, %v3389_v30 }
 0x34e   :  { %v2664_v18 = vpop.eup %2663 }
 0x34f   :  { %v1105_v38 = vmul.f32 %v2664_v18, %v2662_v50  ;;  %v2666_v56 = vpop.eup %2665 }
 0x351   :  { %v3477_v30 = vsel %vm3446_vm12, %v1105_v38, %v3396_v35  ;;  %v332_v35 = vadd.f32 %v3157_v58, %v3253_v13  ;;  %v338_v58 = vadd.f32 %v3165_v62, %v3266_v21  ;;  %v473_v62 = vadd.f32 %v3247_v40, %v3278_v16 }
 0x356   :  { %v2668_v9 = vpop.eup %2667 }
 0x357   :  { %v1130_v0 = vmul.f32 %v2668_v9, %v2666_v56 }
 0x359   :  { %v3470_v7 = vsel %vm3458_vm13, %v1130_v0, %v3403_v10 }
 0x35a   :  { %2484 = vmatprep.subr.mxu1 %v3470_v7 }
 0x35b   :  { %2485 = vmatpush3.msra.mxu1 %v3470_v7 }
 0x35c   :  { %2486 = vmatprep.subr.mxu1 %v3477_v30 }
 0x35d   :  { %2487 = vmatpush3.msra.mxu1 %v3477_v30 }
 0x35e   :  { %2489 = vmatmul.mubr.msk.f32.vlgmr.msra.gmra.mxu1 %vm605_vm1, %v3092_v43 }
 0x35f   :  { %2491 = vmatprep.mubr.msk.f32.mxu1 %vm605_vm1, %v3097_v44 }
 0x362   :  { %2492 = vmatmul.mubr.msk.f32.gmra.mxu1 %vm605_vm1, %v3109_v45 }
 0x363   :  { %2494 = vmatprep.mubr.msk.f32.mxu1 %vm605_vm1, %v3114_v46 }
 0x366   :  { %2495 = vmatmul.mubr.msk.f32.gmra.mxu1 %vm605_vm1, %v3123_v47 }
 0x367   :  { %2497 = vmatprep.mubr.msk.f32.mxu1 %vm605_vm1, %v3128_v48 }
 0x36a   :  { %2498 = vmatmul.mubr.msk.f32.gmra.mxu1 %vm605_vm1, %v3137_v49 }
 0x36b   :  { %2520 = vmatprep.mubr.msk.f32.mxu1 %vm605_vm1, %v3082_v42 }
 0x41e   :  { %v2490_v10 = vpop.f32.mrf.mxu1 }
 0x41f   :  { %v1255_v27 = vadd.f32 %v2490_v10, %v332_v35 }
 0x420   :  { %v1215_v1 = vpop.f32.mrf.mxu1 }
 0x421   :  { %v1259_v19 = vsub.f32 0.0, %v1255_v27  ;;  %v1254_v5 = vadd.f32 %v1215_v1, %v326_v52  ;;  %v4001_v27 = vld [vmem:[#allocation37_spill] sm:$0xff] }
 0x422   :  { %v2493_v32 = vpop.f32.mrf.mxu1  ;;  %v479_v1 = vadd.f32 %v4001_v27, %v3285_v29 }
 0x423   :  { %v1263_v20 = vmul.f32 1.442695, %v1259_v19  ;;  %v1258_v14 = vsub.f32 0.0, %v1254_v5  ;;  %v1257_v9 = vadd.f32 %v2493_v32, %v344_v33 }
 0x424   :  { %v1225_v59 = vpop.f32.mrf.mxu1 }
 0x425   :  { %2669 = vpow2.f32 %v1263_v20  ;;  %v1261_v42 = vmul.f32 1.442695, %v1258_v14  ;;  %v1256_v34 = vadd.f32 %v1225_v59, %v338_v58  ;;  %v1306_v14 = vsel %vm1304_vm14, 1, %v3988_v11 }
 0x426   :  { %v2496_v39 = vpop.f32.mrf.mxu1 }
 0x427   :  { %2671 = vpow2.f32 %v1261_v42  ;;  %v1280_v31 = vadd.f32 %v2496_v39, %v467_v15  ;;  %v1260_v28 = vsub.f32 0.0, %v1256_v34  ;;  %v1310_v42 = vrot.slane %v1306_v14, %v3304_v3 }
 0x428   :  { %v1235_v6 = vpop.f32.mrf.mxu1 }
 0x429   :  { %v1284_v26 = vsub.f32 0.0, %v1280_v31  ;;  %v1279_v61 = vadd.f32 %v1235_v6, %v461_v54  ;;  %v1265_v18 = vmul.f32 1.442695, %v1260_v28  ;;  %vm3518_vm0 = vcmp.eq.s32.totalorder %v1310_v42, 1  ;;  %v3626_v6 = vld [vmem:[%s3950_s4 + $0x10] sm:$0xff] }
 0x42a   :  { %v2499_v55 = vpop.f32.mrf.mxu1 }
 0x42b   :  { %v1288_v51 = vmul.f32 1.442695, %v1284_v26  ;;  %v1283_v22 = vsub.f32 0.0, %v1279_v61  ;;  %v1282_v5 = vadd.f32 %v2499_v55, %v479_v1  ;;  %v1314_v26 = vsel %vm1305_vm15, 1, %v3988_v11  ;;  %v3633_v11 = vld [vmem:[%s3950_s4 + $0x18] sm:$0xff] }
 0x42c   :  { %v1245_v50 = vpop.f32.mrf.mxu1  ;;  %v1318_v28 = vrot.slane %v1314_v26, %v3304_v3 }
 0x42d   :  { %2673 = vpow2.f32 %v1288_v51  ;;  %v1286_v36 = vmul.f32 1.442695, %v1283_v22  ;;  %v1281_v38 = vadd.f32 %v1245_v50, %v473_v62 }
 0x42e   :  { %vm3530_vm2 = vcmp.eq.s32.totalorder %v1318_v28, 1 }
 0x42f   :  { %2675 = vpow2.f32 %v1286_v36  ;;  %v1285_v10 = vsub.f32 0.0, %v1281_v38 }
 0x430   :  { %2677 = vpow2.f32 %v1265_v18 }
 0x431   :  { %v1290_v40 = vmul.f32 1.442695, %v1285_v10 }
 0x432   :  { %v2670_v56 = vpop.eup %2669 }
 0x433   :  { %v1268_v0 = vadd.f32 1.0, %v2670_v56 }
 0x434   :  { %v2672_v35 = vpop.eup %2671 }
 0x435   :  { %2679 = vrcp.f32 %v1268_v0  ;;  %v1267_v52 = vadd.f32 1.0, %v2672_v35 }
 0x436   :  { %2681 = vtanh.f32 %v1257_v9 }
 0x437   :  { %2683 = vrcp.f32 %v1267_v52 }
 0x438   :  { %2685 = vpow2.f32 %v1290_v40 }
 0x43a   :  { %v2674_v19 = vpop.eup %2673 }
 0x43b   :  { %v1293_v20 = vadd.f32 1.0, %v2674_v19 }
 0x43c   :  { %v2676_v2 = vpop.eup %2675 }
 0x43d   :  { %2687 = vrcp.f32 %v1293_v20  ;;  %v1292_v32 = vadd.f32 1.0, %v2676_v2  ;;  %v2678_v59 = vpop.eup %2677 }
 0x43e   :  { %2689 = vtanh.f32 %v1282_v5  ;;  %v1269_v31 = vadd.f32 1.0, %v2678_v59  ;;  %v4008_v5 = vld [vmem:[#allocation13_spill] sm:$0xff] }
 0x43f   :  { %2691 = vrcp.f32 %v1292_v32  ;;  %v356_v20 = vadd.f32 %v4008_v5, %v3268_v25  ;;  %v4009_v32 = vld [vmem:[#allocation28_spill] sm:$0xff] }
 0x440   :  { %2693 = vrcp.f32 %v1269_v31  ;;  %v449_v14 = vadd.f32 %v4009_v32, %v3266_v21 }
 0x442   :  { %v2680_v15 = vpop.eup %2679 }
 0x443   :  { %v2682_v58 = vpop.eup %2681  ;;  %v1274_v39 = vmul.f32 %v2680_v15, %v3454_v60  ;;  %v4010_v15 = vld [vmem:[#allocation9_spill] sm:$0xff] }
 0x444   :  { %v2684_v54 = vpop.eup %2683  ;;  %v350_v42 = vadd.f32 %v4010_v15, %v3260_v23 }
 0x445   :  { %v1275_v34 = vmul.f32 %v2684_v54, %v2682_v58  ;;  %v2686_v55 = vpop.eup %2685 }
 0x446   :  { %v1294_v62 = vadd.f32 1.0, %v2686_v55 }
 0x447   :  { %v1276_v61 = vadd.f32 %v1275_v34, %v1274_v39 }
 0x449   :  { %2695 = vtanh.f32 %v1276_v61  ;;  %v3526_v51 = vsel %vm3518_vm0, %v1276_v61, %v3454_v60 }
 0x44a   :  { %v2688_v22 = vpop.eup %2687  ;;  %2697 = vrcp.f32 %v1294_v62  ;;  %v4012_v62 = vld [vmem:[#allocation32_spill] sm:$0xff] }
 0x44b   :  { %v2690_v12 = vpop.eup %2689  ;;  %v1299_v36 = vmul.f32 %v2688_v22, %v3465_v24 }
 0x44c   :  { %v2692_v50 = vpop.eup %2691 }
 0x44d   :  { %v1300_v33 = vmul.f32 %v2692_v50, %v2690_v12  ;;  %v2694_v38 = vpop.eup %2693 }
 0x44f   :  { %v1301_v18 = vadd.f32 %v1300_v33, %v1299_v36  ;;  %v4011_v36 = vld [vmem:[#allocation17_spill] sm:$0xff]  ;;  %v455_v33 = vadd.f32 %v4012_v62, %v3276_v53  ;;  %v3654_v62 = vld [vmem:[%s3950_s4 + $0x30] sm:$0xff] }
 0x450   :  { %v362_v50 = vadd.f32 %v4011_v36, %v3278_v16 }
 0x451   :  { %2699 = vtanh.f32 %v1301_v18  ;;  %v3537_v60 = vsel %vm3530_vm2, %v1301_v18, %v3465_v24 }
 0x456   :  { %v2696_v3 = vpop.eup %2695 }
 0x457   :  { %v1278_v56 = vmul.f32 %v2696_v3, %v2694_v38  ;;  %v2698_v9 = vpop.eup %2697 }
 0x459   :  { %v3549_v24 = vsel %vm3518_vm0, %v1278_v56, %v3477_v30 }
 0x45e   :  { %v2700_v0 = vpop.eup %2699 }
 0x45f   :  { %v1303_v35 = vmul.f32 %v2700_v0, %v2698_v9 }
 0x461   :  { %v3542_v10 = vsel %vm3530_vm2, %v1303_v35, %v3470_v7 }
 0x462   :  { %2500 = vmatprep.subr.mxu0 %v3542_v10 }
 0x463   :  { %2501 = vmatpush3.msra.mxu0 %v3542_v10 }
 0x464   :  { %2502 = vmatprep.subr.mxu0 %v3549_v24 }
 0x465   :  { %2503 = vmatpush3.msra.mxu0 %v3549_v24 }
 0x466   :  { %2505 = vmatmul.mubr.msk.f32.vlgmr.msra.gmra.mxu0 %vm605_vm1, %v3092_v43  ;;  %v3570_v43 = vld [vmem:[%s3950_s4] sm:$0xff] }
 0x467   :  { %2507 = vmatprep.mubr.msk.f32.mxu0 %vm605_vm1, %v3097_v44  ;;  %v4006_v44 = vld [vmem:[#allocation24_spill] sm:$0xff] }
 0x46a   :  { %2508 = vmatmul.mubr.msk.f32.gmra.mxu0 %vm605_vm1, %v3109_v45  ;;  %v443_v45 = vadd.f32 %v4006_v44, %v3253_v13 }
 0x46b   :  { %2510 = vmatprep.mubr.msk.f32.mxu0 %vm605_vm1, %v3114_v46 }
 0x46e   :  { %2511 = vmatmul.mubr.msk.f32.gmra.mxu0 %vm605_vm1, %v3123_v47  ;;  %v4007_v47 = vld [vmem:[#allocation20_spill] sm:$0xff] }
 0x46f   :  { %2513 = vmatprep.mubr.msk.f32.mxu0 %vm605_vm1, %v3128_v48  ;;  %v437_v7 = vadd.f32 %v4007_v47, %v3241_v37 }
 0x472   :  { %2514 = vmatmul.mubr.msk.f32.gmra.mxu0 %vm605_vm1, %v3137_v49 }
 0x473   :  { %2536 = vmatprep.mubr.msk.f32.mxu0 %vm605_vm1, %v3570_v43 }
 0x526   :  { %v2506_v46 = vpop.f32.mrf.mxu0 }
 0x527   :  { %v1428_v30 = vadd.f32 %v2506_v46, %v443_v45  ;;  %v4013_v45 = vld [vmem:[#allocation21_spill] sm:$0xff] }
 0x528   :  { %v1388_v48 = vpop.f32.mrf.mxu0  ;;  %v368_v46 = vadd.f32 %v4013_v45, %v3285_v29 }
 0x529   :  { %v1432_v52 = vsub.f32 0.0, %v1428_v30  ;;  %v1427_v27 = vadd.f32 %v1388_v48, %v437_v7 }
 0x52a   :  { %v2509_v49 = vpop.f32.mrf.mxu0 }
 0x52b   :  { %v1436_v1 = vmul.f32 1.442695, %v1432_v52  ;;  %v1431_v40 = vsub.f32 0.0, %v1427_v27  ;;  %v1430_v56 = vadd.f32 %v2509_v49, %v455_v33  ;;  %v3661_v33 = vld [vmem:[%s3950_s4 + $0x38] sm:$0xff] }
 0x52c   :  { %v1398_v19 = vpop.f32.mrf.mxu0 }
 0x52d   :  { %2701 = vpow2.f32 %v1436_v1  ;;  %v1434_v2 = vmul.f32 1.442695, %v1431_v40  ;;  %v1429_v39 = vadd.f32 %v1398_v19, %v449_v14 }
 0x52e   :  { %v2512_v59 = vpop.f32.mrf.mxu0 }
 0x52f   :  { %2703 = vpow2.f32 %v1434_v2  ;;  %v1453_v58 = vadd.f32 %v2512_v59, %v356_v20  ;;  %v1433_v22 = vsub.f32 0.0, %v1429_v39 }
 0x530   :  { %v1408_v54 = vpop.f32.mrf.mxu0 }
 0x531   :  { %v1457_v31 = vsub.f32 0.0, %v1453_v58  ;;  %v1452_v34 = vadd.f32 %v1408_v54, %v350_v42  ;;  %v1438_v18 = vmul.f32 1.442695, %v1433_v22 }
 0x532   :  { %v2515_v26 = vpop.f32.mrf.mxu0 }
 0x533   :  { %v1461_v61 = vmul.f32 1.442695, %v1457_v31  ;;  %v1456_v55 = vsub.f32 0.0, %v1452_v34  ;;  %v1455_v30 = vadd.f32 %v2515_v26, %v368_v46 }
 0x534   :  { %v1418_v12 = vpop.f32.mrf.mxu0 }
 0x535   :  { %2705 = vpow2.f32 %v1461_v61  ;;  %v1459_v28 = vmul.f32 1.442695, %v1456_v55  ;;  %v1454_v38 = vadd.f32 %v1418_v12, %v362_v50  ;;  %v3619_v50 = vld [vmem:[%s3950_s4 + $0x8] sm:$0xff] }
 0x537   :  { %2707 = vpow2.f32 %v1459_v28  ;;  %v1458_v35 = vsub.f32 0.0, %v1454_v38 }
 0x538   :  { %2709 = vpow2.f32 %v1438_v18  ;;  %v4014_v18 = vld [vmem:[#allocation26_spill] sm:$0xff] }
 0x539   :  { %v1463_v47 = vmul.f32 1.442695, %v1458_v35  ;;  %v445_v38 = vadd.f32 %v4014_v18, %v3253_v13 }
 0x53a   :  { %v2702_v3 = vpop.eup %2701 }
 0x53b   :  { %v1441_v9 = vadd.f32 1.0, %v2702_v3 }
 0x53c   :  { %v2704_v0 = vpop.eup %2703 }
 0x53d   :  { %2711 = vrcp.f32 %v1441_v9  ;;  %v1440_v44 = vadd.f32 1.0, %v2704_v0 }
 0x53e   :  { %2713 = vtanh.f32 %v1430_v56  ;;  %v4015_v56 = vld [vmem:[#allocation22_spill] sm:$0xff] }
 0x53f   :  { %2715 = vrcp.f32 %v1440_v44  ;;  %v439_v9 = vadd.f32 %v4015_v56, %v3241_v37 }
 0x540   :  { %2717 = vpow2.f32 %v1463_v47 }
 0x542   :  { %v2706_v7 = vpop.eup %2705 }
 0x543   :  { %v1466_v48 = vadd.f32 1.0, %v2706_v7 }
 0x544   :  { %v2708_v52 = vpop.eup %2707 }
 0x545   :  { %2719 = vrcp.f32 %v1466_v48  ;;  %v1465_v27 = vadd.f32 1.0, %v2708_v52  ;;  %v2710_v49 = vpop.eup %2709  ;;  %v4016_v48 = vld [vmem:[#allocation11_spill] sm:$0xff] }
 0x546   :  { %2721 = vtanh.f32 %v1455_v30  ;;  %v1442_v20 = vadd.f32 1.0, %v2710_v49  ;;  %v354_v52 = vadd.f32 %v4016_v48, %v3268_v25 }
 0x547   :  { %2723 = vrcp.f32 %v1465_v27  ;;  %v4017_v27 = vld [vmem:[#allocation30_spill] sm:$0xff] }
 0x548   :  { %2725 = vrcp.f32 %v1442_v20  ;;  %v451_v49 = vadd.f32 %v4017_v27, %v3266_v21 }
 0x54a   :  { %v2712_v1 = vpop.eup %2711 }
 0x54b   :  { %v2714_v40 = vpop.eup %2713  ;;  %v1447_v19 = vmul.f32 %v2712_v1, %v3526_v51 }
 0x54c   :  { %v2716_v5 = vpop.eup %2715 }
 0x54d   :  { %v1448_v2 = vmul.f32 %v2716_v5, %v2714_v40  ;;  %v2718_v14 = vpop.eup %2717  ;;  %v4018_v40 = vld [vmem:[#allocation7_spill] sm:$0xff] }
 0x54e   :  { %v1467_v54 = vadd.f32 1.0, %v2718_v14 }
 0x54f   :  { %v1449_v32 = vadd.f32 %v1448_v2, %v1447_v19  ;;  %v348_v19 = vadd.f32 %v4018_v40, %v3260_v23 }
 0x551   :  { %2727 = vtanh.f32 %v1449_v32  ;;  %v3594_v59 = vsel %vm3530_vm2, %v1449_v32, %v3526_v51 }
 0x552   :  { %v2720_v15 = vpop.eup %2719  ;;  %2729 = vrcp.f32 %v1467_v54 }
 0x553   :  { %v2722_v42 = vpop.eup %2721  ;;  %v1472_v58 = vmul.f32 %v2720_v15, %v3537_v60 }
 0x554   :  { %v2724_v39 = vpop.eup %2723 }
 0x555   :  { %v1473_v31 = vmul.f32 %v2724_v39, %v2722_v42  ;;  %v2726_v61 = vpop.eup %2725 }
 0x557   :  { %v1474_v34 = vadd.f32 %v1473_v31, %v1472_v58 }
 0x559   :  { %2731 = vtanh.f32 %v1474_v34  ;;  %v3600_v26 = vsel %vm3518_vm0, %v1474_v34, %v3537_v60  ;;  %v4019_v34 = vld [vmem:[#allocation15_spill] sm:$0xff] }
 0x55e   :  { %v2728_v55 = vpop.eup %2727 }
 0x55f   :  { %v1451_v22 = vmul.f32 %v2728_v55, %v2726_v61  ;;  %v2730_v51 = vpop.eup %2729  ;;  %v360_v61 = vadd.f32 %v4019_v34, %v3278_v16  ;;  %v4020_v55 = vld [vmem:[#allocation33_spill] sm:$0xff] }
 0x561   :  { %v3612_v60 = vsel %vm3530_vm2, %v1451_v22, %v3549_v24  ;;  %v3647_v24 = vld [vmem:[%s3950_s4 + $0x28] sm:$0xff]  ;;  %v457_v22 = vadd.f32 %v4020_v55, %v3276_v53 }
 0x566   :  { %v2732_v28 = vpop.eup %2731 }
 0x567   :  { %v1476_v12 = vmul.f32 %v2732_v28, %v2730_v51 }
 0x569   :  { %v3605_v36 = vsel %vm3518_vm0, %v1476_v12, %v3542_v10  ;;  %v3640_v10 = vld [vmem:[%s3950_s4 + $0x20] sm:$0xff]  ;;  %s2861_s4 = smov 32  }
 0x56a   :  { %2516 = vmatprep.subr.mxu1 %v3605_v36 }
 0x56b   :  { %2517 = vmatpush3.msra.mxu1 %v3605_v36 }
 0x56c   :  { %2518 = vmatprep.subr.mxu1 %v3612_v60 }
 0x56d   :  { %2519 = vmatpush3.msra.mxu1 %v3612_v60 }
 0x56e   :  { %2521 = vmatmul.mubr.msk.f32.vlgmr.msra.gmra.mxu1 %vm605_vm1, %v3619_v50 }
 0x56f   :  { %2523 = vmatprep.mubr.msk.f32.mxu1 %vm605_vm1, %v3626_v6 }
 0x572   :  { %2524 = vmatmul.mubr.msk.f32.gmra.mxu1 %vm605_vm1, %v3633_v11 }
 0x573   :  { %2526 = vmatprep.mubr.msk.f32.mxu1 %vm605_vm1, %v3640_v10 }
 0x576   :  { %2527 = vmatmul.mubr.msk.f32.gmra.mxu1 %vm605_vm1, %v3647_v24 }
 0x577   :  { %2529 = vmatprep.mubr.msk.f32.mxu1 %vm605_vm1, %v3654_v62 }
 0x57a   :  { %2530 = vmatmul.mubr.msk.f32.gmra.mxu1 %vm605_vm1, %v3661_v33 }
 0x57b   :  { %2552 = vmatprep.mubr.msk.f32.mxu1 %vm605_vm1, %v3570_v43 }
 0x62e   :  { %v2522_v3 = vpop.f32.mrf.mxu1 }
 0x62f   :  { %v1587_v0 = vadd.f32 %v2522_v3, %v445_v38 }
 0x630   :  { %v1547_v35 = vpop.f32.mrf.mxu1 }
 0x631   :  { %v1591_v44 = vsub.f32 0.0, %v1587_v0  ;;  %v1586_v45 = vadd.f32 %v1547_v35, %v439_v9  ;;  %v4021_v0 = vld [vmem:[#allocation19_spill] sm:$0xff] }
 0x632   :  { %v2525_v46 = vpop.f32.mrf.mxu1  ;;  %v366_v35 = vadd.f32 %v4021_v0, %v3285_v29 }
 0x633   :  { %v1595_v47 = vmul.f32 1.442695, %v1591_v44  ;;  %v1590_v7 = vsub.f32 0.0, %v1586_v45  ;;  %v1589_v18 = vadd.f32 %v2525_v46, %v457_v22 }
 0x634   :  { %v1557_v30 = vpop.f32.mrf.mxu1 }
 0x635   :  { %2733 = vpow2.f32 %v1595_v47  ;;  %v1593_v43 = vmul.f32 1.442695, %v1590_v7  ;;  %v1588_v20 = vadd.f32 %v1557_v30, %v451_v49 }
 0x636   :  { %v2528_v1 = vpop.f32.mrf.mxu1 }
 0x637   :  { %2735 = vpow2.f32 %v1593_v43  ;;  %v1612_v5 = vadd.f32 %v2528_v1, %v354_v52  ;;  %v1592_v39 = vsub.f32 0.0, %v1588_v20 }
 0x638   :  { %v1567_v2 = vpop.f32.mrf.mxu1 }
 0x639   :  { %v1616_v32 = vsub.f32 0.0, %v1612_v5  ;;  %v1611_v14 = vadd.f32 %v1567_v2, %v348_v19  ;;  %v1597_v51 = vmul.f32 1.442695, %v1592_v39 }
 0x63a   :  { %v2531_v15 = vpop.f32.mrf.mxu1 }
 0x63b   :  { %v1620_v42 = vmul.f32 1.442695, %v1616_v32  ;;  %v1615_v58 = vsub.f32 0.0, %v1611_v14  ;;  %v1614_v47 = vadd.f32 %v2531_v15, %v366_v35 }
 0x63c   :  { %v1577_v31 = vpop.f32.mrf.mxu1 }
 0x63d   :  { %2737 = vpow2.f32 %v1620_v42  ;;  %v1618_v54 = vmul.f32 1.442695, %v1615_v58  ;;  %v1613_v28 = vadd.f32 %v1577_v31, %v360_v61 }
 0x63f   :  { %2739 = vpow2.f32 %v1618_v54  ;;  %v1617_v56 = vsub.f32 0.0, %v1613_v28 }
 0x640   :  { %2741 = vpow2.f32 %v1597_v51 }
 0x641   :  { %v1622_v44 = vmul.f32 1.442695, %v1617_v56 }
 0x642   :  { %v2734_v12 = vpop.eup %2733 }
 0x643   :  { %v1600_v38 = vadd.f32 1.0, %v2734_v12 }
 0x644   :  { %v2736_v3 = vpop.eup %2735 }
 0x645   :  { %2743 = vrcp.f32 %v1600_v38  ;;  %v1599_v9 = vadd.f32 1.0, %v2736_v3 }
 0x646   :  { %2745 = vtanh.f32 %v1589_v18 }
 0x647   :  { %2747 = vrcp.f32 %v1599_v9 }
 0x648   :  { %2749 = vpow2.f32 %v1622_v44  ;;  %v4024_v44 = vld [vmem:[#allocation10_spill] sm:$0xff] }
 0x64a   :  { %v2738_v45 = vpop.eup %2737 }
 0x64b   :  { %v1625_v7 = vadd.f32 1.0, %v2738_v45  ;;  %v243_v45 = vadd.f32 %v4024_v44, %v3268_v25 }
 0x64c   :  { %v2740_v30 = vpop.eup %2739 }
 0x64d   :  { %2751 = vrcp.f32 %v1625_v7  ;;  %v1624_v48 = vadd.f32 1.0, %v2740_v30  ;;  %v2742_v46 = vpop.eup %2741  ;;  %v4025_v7 = vld [vmem:[#allocation31_spill] sm:$0xff] }
 0x64e   :  { %2753 = vtanh.f32 %v1614_v47  ;;  %v1601_v1 = vadd.f32 1.0, %v2742_v46  ;;  %v562_v30 = vadd.f32 %v4025_v7, %v3266_v21  ;;  %v4026_v46 = vld [vmem:[#allocation6_spill] sm:$0xff] }
 0x64f   :  { %2755 = vrcp.f32 %v1624_v48 }
 0x650   :  { %2757 = vrcp.f32 %v1601_v1 }
 0x652   :  { %v2744_v52 = vpop.eup %2743 }
 0x653   :  { %v2746_v43 = vpop.eup %2745  ;;  %v1606_v27 = vmul.f32 %v2744_v52, %v3594_v59  ;;  %v237_v52 = vadd.f32 %v4026_v46, %v3260_v23 }
 0x654   :  { %v2748_v49 = vpop.eup %2747 }
 0x655   :  { %v1607_v40 = vmul.f32 %v2748_v49, %v2746_v43  ;;  %v2750_v5 = vpop.eup %2749 }
 0x656   :  { %v1626_v42 = vadd.f32 1.0, %v2750_v5 }
 0x657   :  { %v1608_v19 = vadd.f32 %v1607_v40, %v1606_v27 }
 0x659   :  { %2759 = vtanh.f32 %v1608_v19  ;;  %v3687_v20 = vsel %vm3458_vm13, %v1608_v19, %v3594_v59 }
 0x65a   :  { %v2752_v2 = vpop.eup %2751  ;;  %2761 = vrcp.f32 %v1626_v42  ;;  %v4027_v42 = vld [vmem:[#allocation14_spill] sm:$0xff] }
 0x65b   :  { %v2754_v32 = vpop.eup %2753  ;;  %v1631_v14 = vmul.f32 %v2752_v2, %v3600_v26 }
 0x65c   :  { %v2756_v15 = vpop.eup %2755 }
 0x65d   :  { %v1632_v58 = vmul.f32 %v2756_v15, %v2754_v32  ;;  %v2758_v31 = vpop.eup %2757 }
 0x65f   :  { %v1633_v39 = vadd.f32 %v1632_v58, %v1631_v14  ;;  %v249_v58 = vadd.f32 %v4027_v42, %v3278_v16 }
 0x661   :  { %2763 = vtanh.f32 %v1633_v39  ;;  %v3693_v54 = vsel %vm3446_vm12, %v1633_v39, %v3600_v26  ;;  %v4028_v39 = vld [vmem:[#allocation35_spill] sm:$0xff] }
 0x666   :  { %v2760_v34 = vpop.eup %2759 }
 0x667   :  { %v1610_v61 = vmul.f32 %v2760_v34, %v2758_v31  ;;  %v2762_v59 = vpop.eup %2761  ;;  %v568_v31 = vadd.f32 %v4028_v39, %v3276_v53 }
 0x669   :  { %v3705_v26 = vsel %vm3458_vm13, %v1610_v61, %v3612_v60  ;;  %v4023_v60 = vld [vmem:[#allocation23_spill] sm:$0xff] }
 0x66a   :  { %v550_v28 = vadd.f32 %v4023_v60, %v3241_v37  ;;  %v4029_v60 = vld [vmem:[#allocation18_spill] sm:$0xff] }
 0x66e   :  { %v2764_v55 = vpop.eup %2763 }
 0x66f   :  { %v1635_v22 = vmul.f32 %v2764_v55, %v2762_v59 }
 0x671   :  { %v3698_v51 = vsel %vm3446_vm12, %v1635_v22, %v3605_v36 }
 0x672   :  { %2532 = vmatprep.subr.mxu0 %v3698_v51 }
 0x673   :  { %2533 = vmatpush3.msra.mxu0 %v3698_v51 }
 0x674   :  { %2534 = vmatprep.subr.mxu0 %v3705_v26 }
 0x675   :  { %2535 = vmatpush3.msra.mxu0 %v3705_v26 }
 0x676   :  { %2537 = vmatmul.mubr.msk.f32.vlgmr.msra.gmra.mxu0 %vm605_vm1, %v3619_v50 }
 0x677   :  { %2539 = vmatprep.mubr.msk.f32.mxu0 %vm605_vm1, %v3626_v6 }
 0x67a   :  { %2540 = vmatmul.mubr.msk.f32.gmra.mxu0 %vm605_vm1, %v3633_v11 }
 0x67b   :  { %2542 = vmatprep.mubr.msk.f32.mxu0 %vm605_vm1, %v3640_v10 }
 0x67e   :  { %2543 = vmatmul.mubr.msk.f32.gmra.mxu0 %vm605_vm1, %v3647_v24 }
 0x67f   :  { %2545 = vmatprep.mubr.msk.f32.mxu0 %vm605_vm1, %v3654_v62 }
 0x682   :  { %2546 = vmatmul.mubr.msk.f32.gmra.mxu0 %vm605_vm1, %v3661_v33 }
 0x736   :  { %v2538_v36 = vpop.f32.mrf.mxu0 }
 0x737   :  { %v1746_v12 = vadd.f32 %v2538_v36, %v556_v8 }
 0x738   :  { %v1706_v18 = vpop.f32.mrf.mxu0 }
 0x739   :  { %v1750_v38 = vsub.f32 0.0, %v1746_v12  ;;  %v1745_v3 = vadd.f32 %v1706_v18, %v550_v28  ;;  %v255_v28 = vadd.f32 %v4029_v60, %v3285_v29  ;;  %v4033_v60 = vld [vmem:[#allocation34_spill] sm:$0xff] }
 0x73a   :  { %v2541_v56 = vpop.f32.mrf.mxu0 }
 0x73b   :  { %v1754_v9 = vmul.f32 1.442695, %v1750_v38  ;;  %v1749_v0 = vsub.f32 0.0, %v1745_v3  ;;  %v1748_v55 = vadd.f32 %v2541_v56, %v568_v31 }
 0x73c   :  { %v1716_v35 = vpop.f32.mrf.mxu0 }
 0x73d   :  { %2765 = vpow2.f32 %v1754_v9  ;;  %v1752_v47 = vmul.f32 1.442695, %v1749_v0  ;;  %v1747_v27 = vadd.f32 %v1716_v35, %v562_v30 }
 0x73e   :  { %v2544_v48 = vpop.f32.mrf.mxu0 }
 0x73f   :  { %2767 = vpow2.f32 %v1752_v47  ;;  %v1771_v43 = vadd.f32 %v2544_v48, %v243_v45  ;;  %v1751_v32 = vsub.f32 0.0, %v1747_v27 }
 0x740   :  { %v1726_v49 = vpop.f32.mrf.mxu0 }
 0x741   :  { %v1775_v1 = vsub.f32 0.0, %v1771_v43  ;;  %v1770_v40 = vadd.f32 %v1726_v49, %v237_v52  ;;  %v1756_v34 = vmul.f32 1.442695, %v1751_v32 }
 0x742   :  { %v2547_v19 = vpop.f32.mrf.mxu0 }
 0x743   :  { %v1779_v5 = vmul.f32 1.442695, %v1775_v1  ;;  %v1774_v2 = vsub.f32 0.0, %v1770_v40  ;;  %v1773_v38 = vadd.f32 %v2547_v19, %v255_v28 }
 0x744   :  { %v1736_v15 = vpop.f32.mrf.mxu0 }
 0x745   :  { %2769 = vpow2.f32 %v1779_v5  ;;  %v1777_v14 = vmul.f32 1.442695, %v1774_v2  ;;  %v1772_v61 = vadd.f32 %v1736_v15, %v249_v58 }
 0x747   :  { %2771 = vpow2.f32 %v1777_v14  ;;  %v1776_v8 = vsub.f32 0.0, %v1772_v61 }
 0x748   :  { %2773 = vpow2.f32 %v1756_v34 }
 0x749   :  { %v1781_v12 = vmul.f32 1.442695, %v1776_v8 }
 0x74a   :  { %v2766_v59 = vpop.eup %2765 }
 0x74b   :  { %v1759_v22 = vadd.f32 1.0, %v2766_v59 }
 0x74c   :  { %v2768_v41 = vpop.eup %2767 }
 0x74d   :  { %2775 = vrcp.f32 %v1759_v22  ;;  %v1758_v36 = vadd.f32 1.0, %v2768_v41 }
 0x74e   :  { %2777 = vtanh.f32 %v1748_v55 }
 0x74f   :  { %2779 = vrcp.f32 %v1758_v36 }
 0x750   :  { %2781 = vpow2.f32 %v1781_v12  ;;  %v4034_v12 = vld [vmem:[#allocation5_spill] sm:$0xff] }
 0x752   :  { %v2770_v18 = vpop.eup %2769 }
 0x753   :  { %v1784_v3 = vadd.f32 1.0, %v2770_v18 }
 0x754   :  { %v2772_v9 = vpop.eup %2771 }
 0x755   :  { %2783 = vrcp.f32 %v1784_v3  ;;  %v1783_v0 = vadd.f32 1.0, %v2772_v9  ;;  %v2774_v56 = vpop.eup %2773 }
 0x756   :  { %2785 = vtanh.f32 %v1773_v38  ;;  %v1760_v7 = vadd.f32 1.0, %v2774_v56 }
 0x757   :  { %2787 = vrcp.f32 %v1783_v0 }
 0x758   :  { %2789 = vrcp.f32 %v1760_v7  ;;  %v4035_v7 = vld [vmem:[#allocation12_spill] sm:$0xff] }
 0x75a   :  { %v2776_v35 = vpop.eup %2775 }
 0x75b   :  { %v2778_v44 = vpop.eup %2777  ;;  %v1765_v45 = vmul.f32 %v2776_v35, %v3687_v20 }
 0x75c   :  { %v2780_v47 = vpop.eup %2779 }
 0x75d   :  { %v1766_v30 = vmul.f32 %v2780_v47, %v2778_v44  ;;  %v2782_v46 = vpop.eup %2781 }
 0x75e   :  { %v1785_v40 = vadd.f32 1.0, %v2782_v46 }
 0x75f   :  { %v3740_v48 = vadd.f32 %v1766_v30, %v1765_v45  ;;  %v4036_v30 = vld [vmem:[#allocation36_spill] sm:$0xff] }
 0x761   :  { %2791 = vtanh.f32 %v3740_v48  ;;  %v1796_v52 = vsel %vm3383_vm9, %v3740_v48, %v3687_v20 }
 0x762   :  { %v2784_v43 = vpop.eup %2783  ;;  %2793 = vrcp.f32 %v1785_v40 }
 0x763   :  { %v2786_v27 = vpop.eup %2785  ;;  %v1790_v49 = vmul.f32 %v2784_v43, %v3693_v54 }
 0x764   :  { %v2788_v1 = vpop.eup %2787 }
 0x765   :  { %v1791_v19 = vmul.f32 %v2788_v1, %v2786_v27  ;;  %v2790_v32 = vpop.eup %2789 }
 0x767   :  { %v3748_v5 = vadd.f32 %v1791_v19, %v1790_v49 }
 0x769   :  { %2795 = vtanh.f32 %v3748_v5  ;;  %v1798_v2 = vsel %vm3370_vm8, %v3748_v5, %v3693_v54 }
 0x76e   :  { %v2792_v14 = vpop.eup %2791 }
 0x76f   :  { %v1769_v15 = vmul.f32 %v2792_v14, %v2790_v32  ;;  %v2794_v42 = vpop.eup %2793  ;;  %v4037_v14 = vld [vmem:[#allocation16_spill] sm:$0xff] }
 0x771   :  { %v3765_v34 = vsel %vm3383_vm9, %v1769_v15, %v3705_v26  ;;  %v253_v15 = vadd.f32 %v4037_v14, %v3285_v29 }
 0x776   :  { %v2796_v58 = vpop.eup %2795 }
 0x777   :  { %v1794_v39 = vmul.f32 %v2796_v58, %v2794_v42 }
 0x779   :  { %v3758_v31 = vsel %vm3370_vm8, %v1794_v39, %v3698_v51 }
 0x77a   :  { %2548 = vmatprep.subr.mxu1 %v3758_v31 }
 0x77b   :  { %2549 = vmatpush3.msra.mxu1 %v3758_v31 }
 0x77c   :  { %2550 = vmatprep.subr.mxu1 %v3765_v34 }
 0x77d   :  { %2551 = vmatpush3.msra.mxu1 %v3765_v34 }
 0x77e   :  { %2553 = vmatmul.mubr.msk.f32.vlgmr.msra.gmra.mxu1 %vm605_vm1, %v3619_v50  ;;  %v4030_v50 = vld [vmem:[#allocation29_spill] sm:$0xff] }
 0x77f   :  { %2555 = vmatprep.mubr.msk.f32.mxu1 %vm605_vm1, %v3626_v6  ;;  %v558_v51 = vadd.f32 %v4030_v50, %v3253_v13  ;;  %v4031_v6 = vld [vmem:[#allocation25_spill] sm:$0xff]  ;;  %v564_v13 = vadd.f32 %v4033_v60, %v3266_v21  ;;  %v247_v21 = vadd.f32 %v4035_v7, %v3278_v16 }
 0x780   :  { %v552_v61 = vadd.f32 %v4031_v6, %v3241_v37  ;;  %v235_v37 = vadd.f32 %v4034_v12, %v3260_v23  ;;  %v570_v23 = vadd.f32 %v4036_v30, %v3276_v53 }
 0x782   :  { %2556 = vmatmul.mubr.msk.f32.gmra.mxu1 %vm605_vm1, %v3633_v11 }
 0x783   :  { %2558 = vmatprep.mubr.msk.f32.mxu1 %vm605_vm1, %v3640_v10 }
 0x786   :  { %2559 = vmatmul.mubr.msk.f32.gmra.mxu1 %vm605_vm1, %v3647_v24 }
 0x787   :  { %2561 = vmatprep.mubr.msk.f32.mxu1 %vm605_vm1, %v3654_v62  ;;  %v4032_v62 = vld [vmem:[#allocation8_spill] sm:$0xff] }
 0x788   :  { %v241_v36 = vadd.f32 %v4032_v62, %v3268_v25 }
 0x78a   :  { %2562 = vmatmul.mubr.msk.f32.gmra.mxu1 %vm605_vm1, %v3661_v33  ;;  %vm2164_vm1 = vcmask 261120  }
 0x83e   :  { %v2554_v26 = vpop.f32.mrf.mxu1 }
 0x83f   :  { %v1905_v11 = vadd.f32 %v2554_v26, %v558_v51 }
 0x840   :  { %v1865_v59 = vpop.f32.mrf.mxu1 }
 0x841   :  { %v1909_v55 = vsub.f32 0.0, %v1905_v11  ;;  %v1904_v10 = vadd.f32 %v1865_v59, %v552_v61 }
 0x842   :  { %v2557_v22 = vpop.f32.mrf.mxu1 }
 0x843   :  { %v1913_v41 = vmul.f32 1.442695, %v1909_v55  ;;  %v1908_v24 = vsub.f32 0.0, %v1904_v10  ;;  %v1907_v49 = vadd.f32 %v2557_v22, %v570_v23 }
 0x844   :  { %v1875_v8 = vpop.f32.mrf.mxu1 }
 0x845   :  { %2797 = vpow2.f32 %v1913_v41  ;;  %v1911_v33 = vmul.f32 1.442695, %v1908_v24  ;;  %v1906_v38 = vadd.f32 %v1875_v8, %v564_v13 }
 0x846   :  { %v2560_v28 = vpop.f32.mrf.mxu1 }
 0x847   :  { %2799 = vpow2.f32 %v1911_v33  ;;  %v1930_v18 = vadd.f32 %v2560_v28, %v241_v36  ;;  %v1910_v45 = vsub.f32 0.0, %v1906_v38 }
 0x848   :  { %v1885_v3 = vpop.f32.mrf.mxu1 }
 0x849   :  { %v1934_v9 = vsub.f32 0.0, %v1930_v18  ;;  %v1929_v0 = vadd.f32 %v1885_v3, %v235_v37  ;;  %v1915_v46 = vmul.f32 1.442695, %v1910_v45 }
 0x84a   :  { %v2563_v56 = vpop.f32.mrf.mxu1 }
 0x84b   :  { %v1938_v35 = vmul.f32 1.442695, %v1934_v9  ;;  %v1933_v44 = vsub.f32 0.0, %v1929_v0  ;;  %v1932_v58 = vadd.f32 %v2563_v56, %v253_v15 }
 0x84c   :  { %v1895_v47 = vpop.f32.mrf.mxu1 }
 0x84d   :  { %2801 = vpow2.f32 %v1938_v35  ;;  %v1936_v25 = vmul.f32 1.442695, %v1933_v44  ;;  %v1931_v43 = vadd.f32 %v1895_v47, %v247_v21 }
 0x84f   :  { %2803 = vpow2.f32 %v1936_v25  ;;  %v1935_v19 = vsub.f32 0.0, %v1931_v43 }
 0x850   :  { %2805 = vpow2.f32 %v1915_v46 }
 0x851   :  { %v1940_v16 = vmul.f32 1.442695, %v1935_v19 }
 0x852   :  { %v2798_v27 = vpop.eup %2797 }
 0x853   :  { %v1918_v1 = vadd.f32 1.0, %v2798_v27 }
 0x854   :  { %v2800_v40 = vpop.eup %2799 }
 0x855   :  { %2807 = vrcp.f32 %v1918_v1  ;;  %v1917_v32 = vadd.f32 1.0, %v2800_v40 }
 0x856   :  { %2809 = vtanh.f32 %v1907_v49 }
 0x857   :  { %2811 = vrcp.f32 %v1917_v32 }
 0x858   :  { %2813 = vpow2.f32 %v1940_v16 }
 0x85a   :  { %v2802_v42 = vpop.eup %2801 }
 0x85b   :  { %v1943_v39 = vadd.f32 1.0, %v2802_v42  ;;  %v2020_v42 = vld [vmem:[%s3948_s2] sm:$0xff] }
 0x85c   :  { %v2804_v53 = vpop.eup %2803 }
 0x85d   :  { %2815 = vrcp.f32 %v1943_v39  ;;  %v1942_v50 = vadd.f32 1.0, %v2804_v53  ;;  %v2806_v51 = vpop.eup %2805 }
 0x85e   :  { %2817 = vtanh.f32 %v1932_v58  ;;  %v1919_v11 = vadd.f32 1.0, %v2806_v51 }
 0x85f   :  { %2819 = vrcp.f32 %v1942_v50  ;;  %v2021_v50 = vld [vmem:[%s3948_s2 + $0x8] sm:$0xff] }
 0x860   :  { %2821 = vrcp.f32 %v1919_v11  ;;  %v2022_v11 = vld [vmem:[%s3948_s2 + $0x10] sm:$0xff] }
 0x862   :  { %v2808_v26 = vpop.eup %2807 }
 0x863   :  { %v2810_v6 = vpop.eup %2809  ;;  %v1924_v61 = vmul.f32 %v2808_v26, %v1796_v52 }
 0x864   :  { %v2812_v29 = vpop.eup %2811 }
 0x865   :  { %v1925_v59 = vmul.f32 %v2812_v29, %v2810_v6  ;;  %v2814_v10 = vpop.eup %2813 }
 0x866   :  { %v1944_v8 = vadd.f32 1.0, %v2814_v10 }
 0x867   :  { %v1926_v55 = vadd.f32 %v1925_v59, %v1924_v61 }
 0x869   :  { %2823 = vtanh.f32 %v1926_v55 }
 0x86a   :  { %v2816_v22 = vpop.eup %2815  ;;  %2825 = vrcp.f32 %v1944_v8 }
 0x86b   :  { %v2818_v41 = vpop.eup %2817  ;;  %v1949_v24 = vmul.f32 %v2816_v22, %v1798_v2 }
 0x86c   :  { %v2820_v63 = vpop.eup %2819 }
 0x86d   :  { %v1950_v62 = vmul.f32 %v2820_v63, %v2818_v41  ;;  %v2822_v48 = vpop.eup %2821 }
 0x86f   :  { %v1951_v20 = vadd.f32 %v1950_v62, %v1949_v24  ;;  %v2023_v24 = vld [vmem:[%s3948_s2 + $0x18] sm:$0xff] }
 0x871   :  { %2827 = vtanh.f32 %v1951_v20 }
 0x876   :  { %v2824_v52 = vpop.eup %2823 }
 0x877   :  { %v1928_v36 = vmul.f32 %v2824_v52, %v2822_v48  ;;  %v2826_v60 = vpop.eup %2825  ;;  %v2024_v52 = vld [vmem:[%s3948_s2 + $0x20] sm:$0xff] }
 0x879   :  { %v1954_v33 = vsel %vm3311_vm4, %v1928_v36, %v3765_v34  ;;  %vm2198_vm4 = vcmask 392192  }
 0x87a   :  { %1956 = vxpose.xlu0.b32.start.end [1/1] (short) %v1954_v33, 128 }
 0x87e   :  { %v2828_v17 = vpop.eup %2827 }
 0x87f   :  { %v1953_v13 = vmul.f32 %v2828_v17, %v2826_v60 }
 0x881   :  { %v1955_v54 = vsel %vm3321_vm5, %v1953_v13, %v3758_v31 }
 0x882   :  { %1988 = vxpose.xlu1.b32.start.end [1/1] (short) %v1955_v54, 128  ;;  %v2025_v54 = vld [vmem:[%s3948_s2 + $0x28] sm:$0xff] }
 0x8f6   :  { %v1972_v5 = vpop.trf.xlu0 }
 0x8f7   :  { %2052 = vrot.lane.b32.xlu0 %v1972_v5, %s2861_s4 }
 0x8fa   :  { %v1973_v2 = vpop.trf.xlu0 }
 0x8fb   :  { %2054 = vrot.lane.b32.xlu1 %v1973_v2, %s2861_s4 }
 0x8fe   :  { %v1974_v28 = vpop.trf.xlu0  ;;  %v2004_v12 = vpop.trf.xlu1 }
 0x8ff   :  { %2056 = vrot.lane.b32.xlu0 %v1974_v28, %s2861_s4 }
 0x902   :  { %v1975_v57 = vpop.trf.xlu0  ;;  %v2005_v34 = vpop.trf.xlu1 }
 0x903   :  { %2058 = vrot.lane.b32.xlu1 %v1975_v57, %s2861_s4  ;;  %2116 = vrot.lane.b32.xlu0 %v2004_v12, %s2862_s15 }
 0x906   :  { %v1976_v4 = vpop.trf.xlu0  ;;  %v2006_v31 = vpop.trf.xlu1 }
 0x907   :  { %2060 = vrot.lane.b32.xlu0 %v1976_v4, %s2861_s4  ;;  %2118 = vrot.lane.b32.xlu1 %v2005_v34, %s2862_s15  ;;  %v2026_v34 = vld [vmem:[%s3948_s2 + $0x30] sm:$0xff] }
 0x90a   :  { %v1977_v37 = vpop.trf.xlu0  ;;  %v2007_v18 = vpop.trf.xlu1 }
 0x90b   :  { %2062 = vrot.lane.b32.xlu1 %v1977_v37, %s2861_s4  ;;  %2120 = vrot.lane.b32.xlu0 %v2006_v31, %s2862_s15 }
 0x90e   :  { %v1978_v38 = vpop.trf.xlu0  ;;  %v2008_v3 = vpop.trf.xlu1 }
 0x90f   :  { %2064 = vrot.lane.b32.xlu0 %v1978_v38, %s2861_s4  ;;  %2122 = vrot.lane.b32.xlu1 %v2007_v18, %s2862_s15 }
 0x912   :  { %v1979_v9 = vpop.trf.xlu0  ;;  %v2009_v0 = vpop.trf.xlu1 }
 0x913   :  { %2066 = vrot.lane.b32.xlu1 %v1979_v9, %s2861_s4  ;;  %2124 = vrot.lane.b32.xlu0 %v2008_v3, %s2862_s15  ;;  %v2027_v3 = vld [vmem:[%s3948_s2 + $0x38] sm:$0xff] }
 0x916   :  { %v1980_v56 = vpop.trf.xlu0  ;;  %v2010_v35 = vpop.trf.xlu1 }
 0x917   :  { %2068 = vrot.lane.b32.xlu0 %v1980_v56, %s2861_s4  ;;  %2126 = vrot.lane.b32.xlu1 %v2009_v0, %s2862_s15 }
 0x91a   :  { %v1981_v44 = vpop.trf.xlu0  ;;  %v2011_v45 = vpop.trf.xlu1 }
 0x91b   :  { %2070 = vrot.lane.b32.xlu1 %v1981_v44, %s2861_s4  ;;  %2128 = vrot.lane.b32.xlu0 %v2010_v35, %s2862_s15 }
 0x91e   :  { %v1982_v25 = vpop.trf.xlu0  ;;  %v2012_v47 = vpop.trf.xlu1 }
 0x91f   :  { %2072 = vrot.lane.b32.xlu0 %v1982_v25, %s2861_s4  ;;  %2130 = vrot.lane.b32.xlu1 %v2011_v45, %s2862_s15  ;;  %v2028_v45 = vld [vmem:[%s3948_s2 + $0x40] sm:$0xff] }
 0x922   :  { %v1983_v7 = vpop.trf.xlu0  ;;  %v2013_v21 = vpop.trf.xlu1 }
 0x923   :  { %2074 = vrot.lane.b32.xlu1 %v1983_v7, %s2861_s4  ;;  %2132 = vrot.lane.b32.xlu0 %v2012_v47, %s2862_s15 }
 0x926   :  { %v1984_v30 = vpop.trf.xlu0  ;;  %v2014_v23 = vpop.trf.xlu1 }
 0x927   :  { %2076 = vrot.lane.b32.xlu0 %v1984_v30, %s2861_s4  ;;  %2134 = vrot.lane.b32.xlu1 %v2013_v21, %s2862_s15 }
 0x92a   :  { %v1985_v46 = vpop.trf.xlu0  ;;  %v2015_v43 = vpop.trf.xlu1 }
 0x92b   :  { %2078 = vrot.lane.b32.xlu1 %v1985_v46, %s2861_s4  ;;  %2136 = vrot.lane.b32.xlu0 %v2014_v23, %s2862_s15  ;;  %v2029_v23 = vld [vmem:[%s3948_s2 + $0x48] sm:$0xff] }
 0x92e   :  { %v1986_v27 = vpop.trf.xlu0  ;;  %v2016_v49 = vpop.trf.xlu1 }
 0x92f   :  { %2080 = vrot.lane.b32.xlu0 %v1986_v27, %s2861_s4  ;;  %2138 = vrot.lane.b32.xlu1 %v2015_v43, %s2862_s15 }
 0x932   :  { %v1987_v1 = vpop.trf.xlu0  ;;  %v2017_v40 = vpop.trf.xlu1 }
 0x933   :  { %2082 = vrot.lane.b32.xlu1 %v1987_v1, %s2861_s4  ;;  %2140 = vrot.lane.b32.xlu0 %v2016_v49, %s2862_s15 }
 0x936   :  { %v2018_v19 = vpop.trf.xlu1 }
 0x937   :  { %2142 = vrot.lane.b32.xlu1 %v2017_v40, %s2862_s15  ;;  %2144 = vrot.lane.b32.xlu0 %v2018_v19, %s2862_s15  ;;  %v2030_v40 = vld [vmem:[%s3948_s2 + $0x50] sm:$0xff] }
 0x93a   :  { %v2019_v32 = vpop.trf.xlu1 }
 0x93b   :  { %2146 = vrot.lane.b32.xlu1 %v2019_v32, %s2862_s15 }
 0x969   :  { %v2053_v14 = vpop.permute.xlu0 %2052 }
 0x96a   :  { %v2165_v58 = vsel %vm2164_vm1, %v2020_v42, %v2053_v14  ;;  %v2031_v42 = vld [vmem:[%s3948_s2 + $0x58] sm:$0xff] }
 0x96d   :  { %v2055_v16 = vpop.permute.xlu1 %2054 }
 0x96e   :  { %v2166_v6 = vsel %vm2164_vm1, %v2021_v50, %v2055_v16 }
 0x971   :  { %v2057_v15 = vpop.permute.xlu0 %2056 }
 0x972   :  { %v2167_v10 = vsel %vm2164_vm1, %v2022_v11, %v2057_v15 }
 0x975   :  { %v2117_v39 = vpop.permute.xlu0 %2116  ;;  %v2059_v53 = vpop.permute.xlu1 %2058 }
 0x976   :  { %v2182_v51 = vsel %vm2181_vm3, %v2165_v58, %v2117_v39  ;;  %v2168_v62 = vsel %vm2164_vm1, %v2023_v24, %v2059_v53 }
 0x977   :  { %v2199_v26 = vsel %vm2198_vm4, %v2182_v51, 0.0 }
 0x978   :  { %2215 = vst [vmem:[#allocation2] sm:$0xff] %v2199_v26  ;;  %v2032_v26 = vld [vmem:[%s3948_s2 + $0x60] sm:$0xff] }
 0x979   :  { %v2061_v61 = vpop.permute.xlu0 %2060  ;;  %v2119_v29 = vpop.permute.xlu1 %2118 }
 0x97a   :  { %v2183_v59 = vsel %vm2181_vm3, %v2166_v6, %v2119_v29  ;;  %v2169_v60 = vsel %vm2164_vm1, %v2024_v52, %v2061_v61 }
 0x97b   :  { %v2200_v55 = vsel %vm2198_vm4, %v2183_v59, 0.0 }
 0x97c   :  { %2216 = vst [vmem:[#allocation2 + $0x8] sm:$0xff] %v2200_v55  ;;  %v2033_v55 = vld [vmem:[%s3948_s2 + $0x68] sm:$0xff] }
 0x97d   :  { %v2121_v22 = vpop.permute.xlu0 %2120  ;;  %v2063_v41 = vpop.permute.xlu1 %2062 }
 0x97e   :  { %v2184_v63 = vsel %vm2181_vm3, %v2167_v10, %v2121_v22  ;;  %v2170_v28 = vsel %vm2164_vm1, %v2025_v54, %v2063_v41  ;;  %v2034_v10 = vld [vmem:[%s3948_s2 + $0x70] sm:$0xff] }
 0x97f   :  { %v2201_v8 = vsel %vm2198_vm4, %v2184_v63, 0.0 }
 0x980   :  { %2217 = vst [vmem:[#allocation2 + $0x10] sm:$0xff] %v2201_v8 }
 0x981   :  { %v2065_v20 = vpop.permute.xlu0 %2064  ;;  %v2123_v48 = vpop.permute.xlu1 %2122 }
 0x982   :  { %v2185_v36 = vsel %vm2181_vm3, %v2168_v62, %v2123_v48  ;;  %v2171_v37 = vsel %vm2164_vm1, %v2026_v34, %v2065_v20  ;;  %v2035_v20 = vld [vmem:[%s3948_s2 + $0x78] sm:$0xff]  ;;  %s2837_s2 = scalar_lea.vmem %s2237_s20, 2048 }
 0x983   :  { %v2202_v33 = vsel %vm2198_vm4, %v2185_v36, 0.0  ;;  %p2838_p0 = scmp.ne.s32.totalorder %s2237_s20, %s2837_s2  ;;  %p2843_p2 = scmp.lt.s32.totalorder %s2837_s2, %s2837_s2 }
 0x984   :  { %2218 = vst [vmem:[#allocation2 + $0x18] sm:$0xff] %v2202_v33 }
 0x985   :  { %v2125_v17 = vpop.permute.xlu0 %2124  ;;  %v2067_v13 = vpop.permute.xlu1 %2066  ;;  %p2844_p3 = por %p2843_p2, %p2842_p1 }
 0x986   :  { %v2186_v5 = vsel %vm2181_vm3, %v2169_v60, %v2125_v17  ;;  %v2172_v56 = vsel %vm2164_vm1, %v2027_v3, %v2067_v13 }
 0x987   :  { %v2203_v2 = vsel %vm2198_vm4, %v2186_v5, 0.0  ;;  %p2845_p4 = pnand %p2844_p3, %p2838_p0 }
 0x988   :  { %2219 = vst [vmem:[#allocation2 + $0x20] sm:$0xff] %v2203_v2 }
 0x989   :  { %v2069_v12 = vpop.permute.xlu0 %2068  ;;  %v2127_v57 = vpop.permute.xlu1 %2126 }
 0x98a   :  { %v2187_v4 = vsel %vm2181_vm3, %v2170_v28, %v2127_v57  ;;  %v2173_v7 = vsel %vm2164_vm1, %v2028_v45, %v2069_v12 }
 0x98b   :  { %v2204_v31 = vsel %vm2198_vm4, %v2187_v4, 0.0 }
 0x98c   :  { %2220 = vst [vmem:[#allocation2 + $0x28] sm:$0xff] %v2204_v31 }
 0x98d   :  { %v2129_v18 = vpop.permute.xlu0 %2128  ;;  %v2071_v38 = vpop.permute.xlu1 %2070 }
 0x98e   :  { %v2188_v9 = vsel %vm2181_vm3, %v2171_v37, %v2129_v18  ;;  %v2174_v27 = vsel %vm2164_vm1, %v2029_v23, %v2071_v38 }
 0x98f   :  { %v2205_v0 = vsel %vm2198_vm4, %v2188_v9, 0.0 }
 0x990   :  { %2221 = vst [vmem:[#allocation2 + $0x30] sm:$0xff] %v2205_v0 }
 0x991   :  { %v2073_v35 = vpop.permute.xlu0 %2072  ;;  %v2131_v44 = vpop.permute.xlu1 %2130 }
 0x992   :  { %v2189_v25 = vsel %vm2181_vm3, %v2172_v56, %v2131_v44  ;;  %v2175_v14 = vsel %vm2164_vm1, %v2030_v40, %v2073_v35 }
 0x993   :  { %v2206_v47 = vsel %vm2198_vm4, %v2189_v25, 0.0 }
 0x994   :  { %2222 = vst [vmem:[#allocation2 + $0x38] sm:$0xff] %v2206_v47 }
 0x995   :  { %v2133_v21 = vpop.permute.xlu0 %2132  ;;  %v2075_v30 = vpop.permute.xlu1 %2074 }
 0x996   :  { %v2190_v46 = vsel %vm2181_vm3, %v2173_v7, %v2133_v21  ;;  %v2176_v53 = vsel %vm2164_vm1, %v2031_v42, %v2075_v30 }
 0x997   :  { %v2207_v43 = vsel %vm2198_vm4, %v2190_v46, 0.0 }
 0x998   :  { %2223 = vst [vmem:[#allocation2 + $0x40] sm:$0xff] %v2207_v43 }
 0x999   :  { %v2077_v49 = vpop.permute.xlu0 %2076  ;;  %v2135_v1 = vpop.permute.xlu1 %2134 }
 0x99a   :  { %v2191_v19 = vsel %vm2181_vm3, %v2174_v27, %v2135_v1  ;;  %v2177_v29 = vsel %vm2164_vm1, %v2032_v26, %v2077_v49 }
 0x99b   :  { %v2208_v32 = vsel %vm2198_vm4, %v2191_v19, 0.0 }
 0x99c   :  { %2224 = vst [vmem:[#allocation2 + $0x48] sm:$0xff] %v2208_v32 }
 0x99d   :  { %v2137_v15 = vpop.permute.xlu0 %2136  ;;  %v2079_v16 = vpop.permute.xlu1 %2078 }
 0x99e   :  { %v2192_v58 = vsel %vm2181_vm3, %v2175_v14, %v2137_v15  ;;  %v2178_v24 = vsel %vm2164_vm1, %v2033_v55, %v2079_v16 }
 0x99f   :  { %v2209_v39 = vsel %vm2198_vm4, %v2192_v58, 0.0 }
 0x9a0   :  { %2225 = vst [vmem:[#allocation2 + $0x50] sm:$0xff] %v2209_v39 }
 0x9a1   :  { %v2081_v50 = vpop.permute.xlu0 %2080  ;;  %v2139_v51 = vpop.permute.xlu1 %2138 }
 0x9a2   :  { %v2193_v6 = vsel %vm2181_vm3, %v2176_v53, %v2139_v51  ;;  %v2179_v63 = vsel %vm2164_vm1, %v2034_v10, %v2081_v50 }
 0x9a3   :  { %v2210_v61 = vsel %vm2198_vm4, %v2193_v6, 0.0 }
 0x9a4   :  { %2226 = vst [vmem:[#allocation2 + $0x58] sm:$0xff] %v2210_v61 }
 0x9a5   :  { %v2141_v11 = vpop.permute.xlu0 %2140  ;;  %v2083_v59 = vpop.permute.xlu1 %2082 }
 0x9a6   :  { %v2194_v22 = vsel %vm2181_vm3, %v2177_v29, %v2141_v11  ;;  %v2180_v60 = vsel %vm2164_vm1, %v2035_v20, %v2083_v59 }
 0x9a7   :  { %v2211_v41 = vsel %vm2198_vm4, %v2194_v22, 0.0 }
 0x9a8   :  { %2227 = vst [vmem:[#allocation2 + $0x60] sm:$0xff] %v2211_v41 }
 0x9a9   :  { %v2143_v8 = vpop.permute.xlu1 %2142  ;;  %v2145_v62 = vpop.permute.xlu0 %2144 }
 0x9aa   :  { %v2195_v48 = vsel %vm2181_vm3, %v2178_v24, %v2143_v8  ;;  %v2196_v52 = vsel %vm2181_vm3, %v2179_v63, %v2145_v62 }
 0x9ab   :  { %v2212_v36 = vsel %vm2198_vm4, %v2195_v48, 0.0  ;;  %v2213_v33 = vsel %vm2198_vm4, %v2196_v52, 0.0 }
 0x9ac   :  { %2228 = vst [vmem:[#allocation2 + $0x68] sm:$0xff] %v2212_v36  ;;  %2229 = vst [vmem:[#allocation2 + $0x70] sm:$0xff] %v2213_v33 }
 0x9ad   :  { %v2147_v17 = vpop.permute.xlu1 %2146 }
 0x9ae   :  { %v2197_v13 = vsel %vm2181_vm3, %v2180_v60, %v2147_v17 }
 0x9af   :  { %v2214_v54 = vsel %vm2198_vm4, %v2197_v13, 0.0 }
 0x9b0   :  { %2230 = vst [vmem:[#allocation2 + $0x78] sm:$0xff] %v2214_v54 }
 0x9b1   :  { %2848 = shalt.err (!%p2845_p4)
}
 0x9b2   :  { %s2864_s21 = smov 128   ;;  %s2865_s22 = smov 8  }
 0x9b3   :  { %2242 = dma.vmem_to_hbm [thread:$0]  %s2237_s20, 2048, %s3952_s6, [#allocation3], %s2864_s21, %s2864_s21, %s2865_s22  }
 0x9b4   :  { %2857 = dma.done.wait [#allocation3], 2048  }
 0x9b5   :  { %2858 = vsyncadd [#allocation3], 4294965248 }
 0x9b6   :  { %2246 = vsyncpa [#allocation3], 1 }

</bundles_post_ra>
